<compile_context>
chip_gen: v6e
topology: v6e:2x2x1
jax: 0.10.0
libtpu: 0.0.40
codegen_flags: <defaults>
</compile_context>

<pallas_src>
import numpy as np
import jax
import jax.numpy as jnp
from jax.experimental import pallas as pl
from jax.experimental.pallas import tpu as pltpu

# ----- small test config consistent with MLPforNeRF(vp_channels=24, vd_channels=12,
#       n_layers=8, h_channel=64, res_nfeat=3); audiostyle is hard-coded to 64 ch -----
N_LAYERS = 8
H = 64            # h_channel (module default is 256; 64 keeps the test small)
H2 = H // 2
VP = 24           # vp_channels
VD = 12           # vd_channels
AUD = 64          # audiostyle channels (module uses vp_channels + 64 for layer 0)
RES = 3           # res_nfeat
SKIP = N_LAYERS // 2          # skips = [4] -> FeaExt_module_5 sees cat([vps, x])

CIN = 128                     # lane-dense padded channel width of the input slab
VP_OFF, AUD_OFF, VD_OFF = 0, VP, VP + AUD
N_W = 17                      # number of [128,128] weight blocks in the packed stack
N_B = 16                      # bias rows (11 used, padded to 16)
OUT_LANES = 8                 # [rgb_A(3), dens_A(1), rgb_B(3), dens_B(1)]


def mlp_kernel(slab_ref, w_ref, b_ref, out_ref):
    """Fused MLPforNeRF forward for one tile of pixels (two block-diag sub-tiles).

    slab_ref : (T, 128)        bf16  lanes [0:24)=vps, [24:88)=audio, [88:100)=vds, rest 0
    w_ref    : (17, 128, 128)  bf16  zero-padded / block-diagonal weights (see pack_params)
    b_ref    : (16, 1, 128)    f32   duplicated biases (cols 0:64 sub-tile A, 64:128 B)
    out_ref  : (T//2, 8)       f32   lanes 0:3 = rgb/density of pixel-pair member A,
                                     lanes 4:7 = rgb/density of member B
    """
    bf16 = jnp.bfloat16
    T2 = slab_ref.shape[0] // 2
    sa = slab_ref[pl.ds(0, T2), :]       # sub-tile A inputs (bf16, already cast)
    sb = slab_ref[pl.ds(T2, T2), :]      # sub-tile B inputs

    def mm(a_bf, idx):
        return jnp.dot(a_bf, w_ref[idx], preferred_element_type=jnp.float32)

    # FeaExt_module_0 on cat([vps, audio]): one matmul per sub-tile (K=88 is genuine),
    # with output columns 0:64 (A) and 64:128 (B) -> merged activation x.
    x = jnp.maximum(mm(sa, 0) + mm(sb, 1) + b_ref[0], 0.0)

    widx = 2
    for i in range(1, N_LAYERS):
        h = mm(x.astype(bf16), widx)                       # block-diagonal HxH weight
        widx += 1
        if i == SKIP + 1:                                  # FeaExt_module_5: cat([vps, x])
            h = h + mm(sa, widx) + mm(sb, widx + 1)        # vps rows -> cols 0:64 / 64:128
            widx += 2
        x = jnp.maximum(h + b_ref[i], 0.0)

    xb = x.astype(bf16)
    y = mm(xb, 11) + b_ref[8]            # RGB_layer_0 (block-diag, no relu)
    d = mm(xb, 12)                       # density_module -> lane 3 (A) and lane 7 (B)

    # RGB_layer_1 on cat([y, vds]): block-diag x-part + vds matmuls per sub-tile.
    z = jnp.maximum(mm(y.astype(bf16), 13) + mm(sa, 14) + mm(sb, 15) + b_ref[9], 0.0)

    # RGB_layer_2 -> rgb in lanes 0:3 (A) and 4:7 (B); sigmoid (res_nfeat == 3)
    r = mm(z.astype(bf16), 16) + b_ref[10]

    r8 = r[:, :OUT_LANES]
    d8 = d[:, :OUT_LANES]
    lane = jax.lax.broadcasted_iota(jnp.int32, r8.shape, 1)
    is_density = (lane % 4) == 3
    out = jnp.where(is_density, jnp.maximum(d8, 0.0), jax.nn.sigmoid(r8))
    out_ref[...] = out.astype(out_ref.dtype)


def _round_up(x, m):
    return ((x + m - 1) // m) * m


def mlp_for_nerf(audio, vps, vds, wstack, bstack, *, tile_p=2048):
    """Channels-last interface: audio/vps/vds are [P, C]; returns (rgb [P,3], density [P,1])."""
    P = audio.shape[0]
    pad_c = CIN - (VP + AUD + VD)
    slab = jnp.concatenate(
        [vps, audio, vds, jnp.zeros((P, pad_c), vps.dtype)], axis=1).astype(jnp.bfloat16)

    # Tile must be a multiple of 16 (two 8-row-aligned sub-tiles).  Large tiles amortize
    # per-grid-step overhead; clamp so the grid keeps >= 2 steps when possible (megacore).
    tile = max(16, min(_round_up(int(tile_p), 16), _round_up((P + 1) // 2, 16)))
    P_pad = _round_up(P, tile)
    if P_pad != P:
        slab = jnp.pad(slab, ((0, P_pad - P), (0, 0)))
    num_tiles = P_pad // tile
    t2 = tile // 2

    cost = pl.CostEstimate(
        flops=int(2 * (P_pad // 2) * N_W * CIN * CIN),
        transcendentals=int(P_pad * RES),
        bytes_accessed=int(P_pad * CIN * 2 + (P_pad // 2) * OUT_LANES * 4
                           + wstack.size * 2 + bstack.size * 4))

    out = pl.pallas_call(
        mlp_kernel,
        out_shape=jax.ShapeDtypeStruct((P_pad // 2, OUT_LANES), jnp.float32),
        grid_spec=pltpu.PrefetchScalarGridSpec(
            num_scalar_prefetch=0,
            grid=(num_tiles,),
            in_specs=[
                pl.BlockSpec((tile, CIN), lambda i: (i, 0)),      # pixel slab (tiled, bf16)
                pl.BlockSpec(wstack.shape, lambda i: (0, 0, 0)),  # all weights, resident
                pl.BlockSpec(bstack.shape, lambda i: (0, 0, 0)),  # all biases, resident
            ],
            out_specs=pl.BlockSpec((t2, OUT_LANES), lambda i: (i, 0)),
        ),
        compiler_params=pltpu.CompilerParams(dimension_semantics=("parallel",)),
        cost_estimate=cost,
    )(slab, wstack, bstack)

    # Un-interleave pixel pairs: output row j of tile i holds pixel i*tile + j in lanes
    # 0:4 and pixel i*tile + tile//2 + j in lanes 4:8.
    out = out.reshape(num_tiles, t2, 2, RES + 1)
    out = jnp.transpose(out, (0, 2, 1, 3)).reshape(P_pad, RES + 1)
    out = out[:P]
    return out[:, :RES], out[:, RES:RES + 1]


def mlp_for_nerf_nchw(audiostyle, batch_embed_vps, batch_embed_vds, wstack, bstack,
                      *, tile_p=2048):
    """Same NCHW interface as the PyTorch module: [B, C, N_r, N_s] in, NCHW out."""
    B, _, NR, NS = batch_embed_vps.shape

    def flat(x):
        return jnp.transpose(x, (0, 2, 3, 1)).reshape(B * NR * NS, x.shape[1])

    rgb, density = mlp_for_nerf(flat(audiostyle), flat(batch_embed_vps),
                                flat(batch_embed_vds), wstack, bstack, tile_p=tile_p)

    def unflat(y):
        return jnp.transpose(y.reshape(B, NR, NS, y.shape[-1]), (0, 3, 1, 2))

    return unflat(rgb), unflat(density)


def init_params(key):
    """Deterministic Xavier-style init; weights stored transposed as [in, out]."""
    keys = iter(jax.random.split(key, 32))

    def xavier(shape):
        fan_in, fan_out = shape
        lim = float(np.sqrt(6.0 / (fan_in + fan_out)))
        return jax.random.uniform(next(keys), shape, jnp.float32, -lim, lim)

    def bias(n):
        return jax.random.uniform(next(keys), (n,), jnp.float32, -0.05, 0.05)

    p = {}
    w0 = xavier((VP + AUD, H))                       # FeaExt_module_0 on cat([vps, audio])
    p['w0_vp'], p['w0_au'], p['b0'] = w0[:VP], w0[VP:], bias(H)
    for i in range(1, N_LAYERS):
        if i == SKIP + 1:                            # FeaExt_module_5 on cat([vps, x])
            w = xavier((VP + H, H))
            p['w5_vp'], p[f'w{i}'] = w[:VP], w[VP:]
        else:
            p[f'w{i}'] = xavier((H, H))
        p[f'b{i}'] = bias(H)
    p['w_d'] = xavier((H, 1))                        # density_module (module zeroes its bias)
    p['w_r0'], p['b_r0'] = xavier((H, H)), bias(H)   # RGB_layer_0
    w1 = xavier((H + VD, H2))                        # RGB_layer_1 on cat([x, vds])
    p['w_r1x'], p['w_r1v'], p['b_r1'] = w1[:H], w1[H:], bias(H2)
    p['w_r2'], p['b_r2'] = xavier((H2, RES)), bias(RES)
    return p


def pack_params(p):
    """Pack all weights into one bf16 [17,128,128] stack (block-diagonal pixel-pair
    layout: sub-tile A uses lanes 0:64, sub-tile B lanes 64:128) and all biases into
    one f32 [16,1,128] stack.  Channel concats (vps skip, vds) become zero-padded row
    blocks against the input slab; density lands in output lanes 3 / 7."""
    # Invariants the kernel's lane layout relies on — do not change silently.
    assert 2 * H == CIN, "block-diag packing needs the hidden width to be exactly half of CIN"
    assert VP + AUD + VD <= CIN and VD_OFF + VD <= CIN
    assert OUT_LANES == 2 * (RES + 1) and RES + 1 <= 4

    def blk():
        return np.zeros((CIN, CIN), np.float32)

    def diag(w64):
        b = blk()
        w = np.asarray(w64)
        b[0:H, 0:H] = w
        b[H:2 * H, H:2 * H] = w
        return b

    W = []
    # 0/1: FeaExt_module_0, output cols 0:H for sub-tile A, H:2H for sub-tile B.
    for col0 in (0, H):
        w = blk()
        w[VP_OFF:VP_OFF + VP, col0:col0 + H] = np.asarray(p['w0_vp'])
        w[AUD_OFF:AUD_OFF + AUD, col0:col0 + H] = np.asarray(p['w0_au'])
        W.append(w)
    # 2..10: FeaExt_module_1..7 block-diag; extra vps blocks for the skip layer.
    for i in range(1, N_LAYERS):
        W.append(diag(p[f'w{i}']))
        if i == SKIP + 1:
            for col0 in (0, H):
                w = blk()
                w[VP_OFF:VP_OFF + VP, col0:col0 + H] = np.asarray(p['w5_vp'])
                W.append(w)
    # 11: RGB_layer_0 block-diag.
    W.append(diag(p['w_r0']))
    # 12: density_module -> lane 3 (A) / lane 7 (B); bias stays 0 (module zeroes it).
    w = blk()
    w[0:H, 3:4] = np.asarray(p['w_d'])
    w[H:2 * H, 7:8] = np.asarray(p['w_d'])
    W.append(w)
    # 13: RGB_layer_1 x-part block-diag (32-wide halves: cols 0:32 / 64:96).
    w = blk()
    w[0:H, 0:H2] = np.asarray(p['w_r1x'])
    w[H:2 * H, H:H + H2] = np.asarray(p['w_r1x'])
    W.append(w)
    # 14/15: RGB_layer_1 vds-part for A / B (rows = vds lanes of the slab).
    for col0 in (0, H):
        w = blk()
        w[VD_OFF:VD_OFF + VD, col0:col0 + H2] = np.asarray(p['w_r1v'])
        W.append(w)
    # 16: RGB_layer_2 -> rgb lanes 0:3 (A) and 4:7 (B).
    w = blk()
    w[0:H2, 0:RES] = np.asarray(p['w_r2'])
    w[H:H + H2, 4:4 + RES] = np.asarray(p['w_r2'])
    W.append(w)
    assert len(W) == N_W
    wstack = jnp.asarray(np.stack(W, axis=0)).astype(jnp.bfloat16)

    B = np.zeros((N_B, 1, CIN), np.float32)

    def dup(b64):
        v = np.asarray(b64)
        row = np.zeros(CIN, np.float32)
        row[0:v.shape[0]] = v
        row[H:H + v.shape[0]] = v
        return row

    B[0, 0] = dup(p['b0'])
    for i in range(1, N_LAYERS):
        B[i, 0] = dup(p[f'b{i}'])
    B[8, 0] = dup(p['b_r0'])
    B[9, 0] = dup(p['b_r1'])
    br2 = np.zeros(CIN, np.float32)
    br2[0:RES] = np.asarray(p['b_r2'])
    br2[4:4 + RES] = np.asarray(p['b_r2'])
    B[10, 0] = br2
    return wstack, jnp.asarray(B)


def reference(audio, vps, vds, p, *, bf16_dots=True):
    """Pure-JAX replica of the PyTorch forward.  With bf16_dots=True the matmul
    operands are rounded to bf16 (f32 accumulation), mirroring the kernel."""
    cast = (lambda a: a.astype(jnp.bfloat16)) if bf16_dots else (lambda a: a)

    def mm(a, w):
        return jnp.dot(cast(a), cast(w), preferred_element_type=jnp.float32)

    x = jax.nn.relu(mm(vps, p['w0_vp']) + mm(audio, p['w0_au']) + p['b0'])
    for i in range(1, N_LAYERS):
        h = mm(x, p[f'w{i}'])
        if i == SKIP + 1:
            h = h + mm(vps, p['w5_vp'])
        x = jax.nn.relu(h + p[f'b{i}'])
    density = jax.nn.relu(mm(x, p['w_d']))               # density bias == 0
    xr = mm(x, p['w_r0']) + p['b_r0']                    # no relu after RGB_layer_0
    z = jax.nn.relu(mm(xr, p['w_r1x']) + mm(vds, p['w_r1v']) + p['b_r1'])
    rgb = jax.nn.sigmoid(mm(z, p['w_r2']) + p['b_r2'])
    return rgb, density


if __name__ == "__main__":
    key = jax.random.PRNGKey(0)
    B_, NR, NS = 2, 16, 16            # torch shapes: [B, C, N_r, N_s]; P = 512 pixels
    k1, k2, k3, k4 = jax.random.split(key, 4)
    audio = jax.random.normal(k1, (B_, AUD, NR, NS), jnp.float32)   # audiostyle
    vps = jax.random.normal(k2, (B_, VP, NR, NS), jnp.float32)      # batch_embed_vps
    vds = jax.random.normal(k3, (B_, VD, NR, NS), jnp.float32)      # batch_embed_vds
    params = init_params(k4)
    wstack, bstack = pack_params(params)

    rgb, density = mlp_for_nerf_nchw(audio, vps, vds, wstack, bstack)
    jax.block_until_ready((rgb, density))
    assert rgb.shape == (B_, RES, NR, NS) and density.shape == (B_, 1, NR, NS)

    def flat(x):
        return jnp.transpose(x, (0, 2, 3, 1)).reshape(-1, x.shape[1])

    rgb_k = np.asarray(flat(rgb))
    den_k = np.asarray(flat(density))
    a_f, p_f, d_f = flat(audio), flat(vps), flat(vds)

    # Wiring check vs a reference that mirrors the kernel's bf16-operand matmul precision
    # (summation-order differences across 10+ layers allow a small tolerance).
    rgb_bf, den_bf = reference(a_f, p_f, d_f, params, bf16_dots=True)
    assert np.allclose(rgb_k, np.asarray(rgb_bf), rtol=2e-2, atol=2e-2), "rgb mismatch (bf16 ref)"
    assert np.allclose(den_k, np.asarray(den_bf), rtol=2e-2, atol=2e-2), "density mismatch (bf16 ref)"

    # Loose sanity check vs the full-f32, PyTorch-faithful reference.
    rgb32, den32 = reference(a_f, p_f, d_f, params, bf16_dots=False)
    assert np.allclose(rgb_k, np.asarray(rgb32), rtol=0.25, atol=0.25), "rgb far from f32 ref"
    assert np.allclose(den_k, np.asarray(den32), rtol=0.25, atol=0.25), "density far from f32 ref"

    print("KERNEL_OK")
</pallas_src>

<mosaic_0001>
module attributes {stable_mosaic.version = 11 : i64} {
  func.func @mlp_kernel(%arg0: i32, %arg1: memref<256x128xbf16, #tpu.memory_space<vmem>>, %arg2: memref<17x128x128xbf16, #tpu.memory_space<vmem>>, %arg3: memref<16x1x128xf32, #tpu.memory_space<vmem>>, %arg4: memref<128x8xf32, #tpu.memory_space<vmem>>) attributes {dimension_semantics = [#tpu.dimension_semantics<parallel>], iteration_bounds = array<i64: 2>, scalar_prefetch = 0 : i64, scratch_operands = 0 : i64, tpu.core_type = #tpu.core_type<tc>, window_params = [{transform_indices = @transform_0, window_bounds = array<i64: 256, 128>}, {pipeline_mode = #tpu.pipeline_mode<synchronous>, transform_indices = @transform_1, window_bounds = array<i64: 17, 128, 128>}, {pipeline_mode = #tpu.pipeline_mode<synchronous>, transform_indices = @transform_2, window_bounds = array<i64: 16, 1, 128>}, {transform_indices = @transform_3, window_bounds = array<i64: 128, 8>}]} {
    %c0 = arith.constant 0 : index
    %c0_0 = arith.constant 0 : index
    %0 = vector.load %arg1[%c0, %c0_0] : memref<256x128xbf16, #tpu.memory_space<vmem>>, vector<128x128xbf16>
    %c128 = arith.constant 128 : index
    %c0_1 = arith.constant 0 : index
    %1 = vector.load %arg1[%c128, %c0_1] : memref<256x128xbf16, #tpu.memory_space<vmem>>, vector<128x128xbf16>
    %c0_2 = arith.constant 0 : index
    %c0_3 = arith.constant 0 : index
    %c0_4 = arith.constant 0 : index
    %2 = vector.load %arg2[%c0_2, %c0_3, %c0_4] : memref<17x128x128xbf16, #tpu.memory_space<vmem>>, vector<1x128x128xbf16>
    %3 = vector.shape_cast %2 : vector<1x128x128xbf16> to vector<128x128xbf16>
    %cst = arith.constant dense<0.000000e+00> : vector<128x128xf32>
    %4 = tpu.matmul %0, %3, %cst {dimension_numbers = #tpu.dot_dimension_numbers<[1], [0], [0], [1], [0, 0, 1, 1], [], []>} : vector<128x128xbf16>, vector<128x128xbf16>, vector<128x128xf32> -> vector<128x128xf32>
    %c1 = arith.constant 1 : index
    %c0_5 = arith.constant 0 : index
    %c0_6 = arith.constant 0 : index
    %5 = vector.load %arg2[%c1, %c0_5, %c0_6] : memref<17x128x128xbf16, #tpu.memory_space<vmem>>, vector<1x128x128xbf16>
    %6 = vector.shape_cast %5 : vector<1x128x128xbf16> to vector<128x128xbf16>
    %cst_7 = arith.constant dense<0.000000e+00> : vector<128x128xf32>
    %7 = tpu.matmul %1, %6, %cst_7 {dimension_numbers = #tpu.dot_dimension_numbers<[1], [0], [0], [1], [0, 0, 1, 1], [], []>} : vector<128x128xbf16>, vector<128x128xbf16>, vector<128x128xf32> -> vector<128x128xf32>
    %8 = arith.addf %4, %7 : vector<128x128xf32>
    %c0_8 = arith.constant 0 : index
    %c0_9 = arith.constant 0 : index
    %c0_10 = arith.constant 0 : index
    %9 = vector.load %arg3[%c0_8, %c0_9, %c0_10] : memref<16x1x128xf32, #tpu.memory_space<vmem>>, vector<1x1x128xf32>
    %10 = vector.shape_cast %9 : vector<1x1x128xf32> to vector<1x128xf32>
    %11 = vector.broadcast %10 : vector<1x128xf32> to vector<128x128xf32>
    %12 = arith.addf %8, %11 : vector<128x128xf32>
    %cst_11 = arith.constant 0.000000e+00 : f32
    %13 = vector.broadcast %cst_11 : f32 to vector<128x128xf32>
    %14 = arith.maximumf %12, %13 : vector<128x128xf32>
    %15 = arith.truncf %14 : vector<128x128xf32> to vector<128x128xbf16>
    %c2 = arith.constant 2 : index
    %c0_12 = arith.constant 0 : index
    %c0_13 = arith.constant 0 : index
    %16 = vector.load %arg2[%c2, %c0_12, %c0_13] : memref<17x128x128xbf16, #tpu.memory_space<vmem>>, vector<1x128x128xbf16>
    %17 = vector.shape_cast %16 : vector<1x128x128xbf16> to vector<128x128xbf16>
    %cst_14 = arith.constant dense<0.000000e+00> : vector<128x128xf32>
    %18 = tpu.matmul %15, %17, %cst_14 {dimension_numbers = #tpu.dot_dimension_numbers<[1], [0], [0], [1], [0, 0, 1, 1], [], []>} : vector<128x128xbf16>, vector<128x128xbf16>, vector<128x128xf32> -> vector<128x128xf32>
    %c1_15 = arith.constant 1 : index
    %c0_16 = arith.constant 0 : index
    %c0_17 = arith.constant 0 : index
    %19 = vector.load %arg3[%c1_15, %c0_16, %c0_17] : memref<16x1x128xf32, #tpu.memory_space<vmem>>, vector<1x1x128xf32>
    %20 = vector.shape_cast %19 : vector<1x1x128xf32> to vector<1x128xf32>
    %21 = vector.broadcast %20 : vector<1x128xf32> to vector<128x128xf32>
    %22 = arith.addf %18, %21 : vector<128x128xf32>
    %cst_18 = arith.constant 0.000000e+00 : f32
    %23 = vector.broadcast %cst_18 : f32 to vector<128x128xf32>
    %24 = arith.maximumf %22, %23 : vector<128x128xf32>
    %25 = arith.truncf %24 : vector<128x128xf32> to vector<128x128xbf16>
    %c3 = arith.constant 3 : index
    %c0_19 = arith.constant 0 : index
    %c0_20 = arith.constant 0 : index
    %26 = vector.load %arg2[%c3, %c0_19, %c0_20] : memref<17x128x128xbf16, #tpu.memory_space<vmem>>, vector<1x128x128xbf16>
    %27 = vector.shape_cast %26 : vector<1x128x128xbf16> to vector<128x128xbf16>
    %cst_21 = arith.constant dense<0.000000e+00> : vector<128x128xf32>
    %28 = tpu.matmul %25, %27, %cst_21 {dimension_numbers = #tpu.dot_dimension_numbers<[1], [0], [0], [1], [0, 0, 1, 1], [], []>} : vector<128x128xbf16>, vector<128x128xbf16>, vector<128x128xf32> -> vector<128x128xf32>
    %c2_22 = arith.constant 2 : index
    %c0_23 = arith.constant 0 : index
    %c0_24 = arith.constant 0 : index
    %29 = vector.load %arg3[%c2_22, %c0_23, %c0_24] : memref<16x1x128xf32, #tpu.memory_space<vmem>>, vector<1x1x128xf32>
    %30 = vector.shape_cast %29 : vector<1x1x128xf32> to vector<1x128xf32>
    %31 = vector.broadcast %30 : vector<1x128xf32> to vector<128x128xf32>
    %32 = arith.addf %28, %31 : vector<128x128xf32>
    %cst_25 = arith.constant 0.000000e+00 : f32
    %33 = vector.broadcast %cst_25 : f32 to vector<128x128xf32>
    %34 = arith.maximumf %32, %33 : vector<128x128xf32>
    %35 = arith.truncf %34 : vector<128x128xf32> to vector<128x128xbf16>
    %c4 = arith.constant 4 : index
    %c0_26 = arith.constant 0 : index
    %c0_27 = arith.constant 0 : index
    %36 = vector.load %arg2[%c4, %c0_26, %c0_27] : memref<17x128x128xbf16, #tpu.memory_space<vmem>>, vector<1x128x128xbf16>
    %37 = vector.shape_cast %36 : vector<1x128x128xbf16> to vector<128x128xbf16>
    %cst_28 = arith.constant dense<0.000000e+00> : vector<128x128xf32>
    %38 = tpu.matmul %35, %37, %cst_28 {dimension_numbers = #tpu.dot_dimension_numbers<[1], [0], [0], [1], [0, 0, 1, 1], [], []>} : vector<128x128xbf16>, vector<128x128xbf16>, vector<128x128xf32> -> vector<128x128xf32>
    %c3_29 = arith.constant 3 : index
    %c0_30 = arith.constant 0 : index
    %c0_31 = arith.constant 0 : index
    %39 = vector.load %arg3[%c3_29, %c0_30, %c0_31] : memref<16x1x128xf32, #tpu.memory_space<vmem>>, vector<1x1x128xf32>
    %40 = vector.shape_cast %39 : vector<1x1x128xf32> to vector<1x128xf32>
    %41 = vector.broadcast %40 : vector<1x128xf32> to vector<128x128xf32>
    %42 = arith.addf %38, %41 : vector<128x128xf32>
    %cst_32 = arith.constant 0.000000e+00 : f32
    %43 = vector.broadcast %cst_32 : f32 to vector<128x128xf32>
    %44 = arith.maximumf %42, %43 : vector<128x128xf32>
    %45 = arith.truncf %44 : vector<128x128xf32> to vector<128x128xbf16>
    %c5 = arith.constant 5 : index
    %c0_33 = arith.constant 0 : index
    %c0_34 = arith.constant 0 : index
    %46 = vector.load %arg2[%c5, %c0_33, %c0_34] : memref<17x128x128xbf16, #tpu.memory_space<vmem>>, vector<1x128x128xbf16>
    %47 = vector.shape_cast %46 : vector<1x128x128xbf16> to vector<128x128xbf16>
    %cst_35 = arith.constant dense<0.000000e+00> : vector<128x128xf32>
    %48 = tpu.matmul %45, %47, %cst_35 {dimension_numbers = #tpu.dot_dimension_numbers<[1], [0], [0], [1], [0, 0, 1, 1], [], []>} : vector<128x128xbf16>, vector<128x128xbf16>, vector<128x128xf32> -> vector<128x128xf32>
    %c4_36 = arith.constant 4 : index
    %c0_37 = arith.constant 0 : index
    %c0_38 = arith.constant 0 : index
    %49 = vector.load %arg3[%c4_36, %c0_37, %c0_38] : memref<16x1x128xf32, #tpu.memory_space<vmem>>, vector<1x1x128xf32>
    %50 = vector.shape_cast %49 : vector<1x1x128xf32> to vector<1x128xf32>
    %51 = vector.broadcast %50 : vector<1x128xf32> to vector<128x128xf32>
    %52 = arith.addf %48, %51 : vector<128x128xf32>
    %cst_39 = arith.constant 0.000000e+00 : f32
    %53 = vector.broadcast %cst_39 : f32 to vector<128x128xf32>
    %54 = arith.maximumf %52, %53 : vector<128x128xf32>
    %55 = arith.truncf %54 : vector<128x128xf32> to vector<128x128xbf16>
    %c6 = arith.constant 6 : index
    %c0_40 = arith.constant 0 : index
    %c0_41 = arith.constant 0 : index
    %56 = vector.load %arg2[%c6, %c0_40, %c0_41] : memref<17x128x128xbf16, #tpu.memory_space<vmem>>, vector<1x128x128xbf16>
    %57 = vector.shape_cast %56 : vector<1x128x128xbf16> to vector<128x128xbf16>
    %cst_42 = arith.constant dense<0.000000e+00> : vector<128x128xf32>
    %58 = tpu.matmul %55, %57, %cst_42 {dimension_numbers = #tpu.dot_dimension_numbers<[1], [0], [0], [1], [0, 0, 1, 1], [], []>} : vector<128x128xbf16>, vector<128x128xbf16>, vector<128x128xf32> -> vector<128x128xf32>
    %c7 = arith.constant 7 : index
    %c0_43 = arith.constant 0 : index
    %c0_44 = arith.constant 0 : index
    %59 = vector.load %arg2[%c7, %c0_43, %c0_44] : memref<17x128x128xbf16, #tpu.memory_space<vmem>>, vector<1x128x128xbf16>
    %60 = vector.shape_cast %59 : vector<1x128x128xbf16> to vector<128x128xbf16>
    %cst_45 = arith.constant dense<0.000000e+00> : vector<128x128xf32>
    %61 = tpu.matmul %0, %60, %cst_45 {dimension_numbers = #tpu.dot_dimension_numbers<[1], [0], [0], [1], [0, 0, 1, 1], [], []>} : vector<128x128xbf16>, vector<128x128xbf16>, vector<128x128xf32> -> vector<128x128xf32>
    %62 = arith.addf %58, %61 : vector<128x128xf32>
    %c8 = arith.constant 8 : index
    %c0_46 = arith.constant 0 : index
    %c0_47 = arith.constant 0 : index
    %63 = vector.load %arg2[%c8, %c0_46, %c0_47] : memref<17x128x128xbf16, #tpu.memory_space<vmem>>, vector<1x128x128xbf16>
    %64 = vector.shape_cast %63 : vector<1x128x128xbf16> to vector<128x128xbf16>
    %cst_48 = arith.constant dense<0.000000e+00> : vector<128x128xf32>
    %65 = tpu.matmul %1, %64, %cst_48 {dimension_numbers = #tpu.dot_dimension_numbers<[1], [0], [0], [1], [0, 0, 1, 1], [], []>} : vector<128x128xbf16>, vector<128x128xbf16>, vector<128x128xf32> -> vector<128x128xf32>
    %66 = arith.addf %62, %65 : vector<128x128xf32>
    %c5_49 = arith.constant 5 : index
    %c0_50 = arith.constant 0 : index
    %c0_51 = arith.constant 0 : index
    %67 = vector.load %arg3[%c5_49, %c0_50, %c0_51] : memref<16x1x128xf32, #tpu.memory_space<vmem>>, vector<1x1x128xf32>
    %68 = vector.shape_cast %67 : vector<1x1x128xf32> to vector<1x128xf32>
    %69 = vector.broadcast %68 : vector<1x128xf32> to vector<128x128xf32>
    %70 = arith.addf %66, %69 : vector<128x128xf32>
    %cst_52 = arith.constant 0.000000e+00 : f32
    %71 = vector.broadcast %cst_52 : f32 to vector<128x128xf32>
    %72 = arith.maximumf %70, %71 : vector<128x128xf32>
    %73 = arith.truncf %72 : vector<128x128xf32> to vector<128x128xbf16>
    %c9 = arith.constant 9 : index
    %c0_53 = arith.constant 0 : index
    %c0_54 = arith.constant 0 : index
    %74 = vector.load %arg2[%c9, %c0_53, %c0_54] : memref<17x128x128xbf16, #tpu.memory_space<vmem>>, vector<1x128x128xbf16>
    %75 = vector.shape_cast %74 : vector<1x128x128xbf16> to vector<128x128xbf16>
    %cst_55 = arith.constant dense<0.000000e+00> : vector<128x128xf32>
    %76 = tpu.matmul %73, %75, %cst_55 {dimension_numbers = #tpu.dot_dimension_numbers<[1], [0], [0], [1], [0, 0, 1, 1], [], []>} : vector<128x128xbf16>, vector<128x128xbf16>, vector<128x128xf32> -> vector<128x128xf32>
    %c6_56 = arith.constant 6 : index
    %c0_57 = arith.constant 0 : index
    %c0_58 = arith.constant 0 : index
    %77 = vector.load %arg3[%c6_56, %c0_57, %c0_58] : memref<16x1x128xf32, #tpu.memory_space<vmem>>, vector<1x1x128xf32>
    %78 = vector.shape_cast %77 : vector<1x1x128xf32> to vector<1x128xf32>
    %79 = vector.broadcast %78 : vector<1x128xf32> to vector<128x128xf32>
    %80 = arith.addf %76, %79 : vector<128x128xf32>
    %cst_59 = arith.constant 0.000000e+00 : f32
    %81 = vector.broadcast %cst_59 : f32 to vector<128x128xf32>
    %82 = arith.maximumf %80, %81 : vector<128x128xf32>
    %83 = arith.truncf %82 : vector<128x128xf32> to vector<128x128xbf16>
    %c10 = arith.constant 10 : index
    %c0_60 = arith.constant 0 : index
    %c0_61 = arith.constant 0 : index
    %84 = vector.load %arg2[%c10, %c0_60, %c0_61] : memref<17x128x128xbf16, #tpu.memory_space<vmem>>, vector<1x128x128xbf16>
    %85 = vector.shape_cast %84 : vector<1x128x128xbf16> to vector<128x128xbf16>
    %cst_62 = arith.constant dense<0.000000e+00> : vector<128x128xf32>
    %86 = tpu.matmul %83, %85, %cst_62 {dimension_numbers = #tpu.dot_dimension_numbers<[1], [0], [0], [1], [0, 0, 1, 1], [], []>} : vector<128x128xbf16>, vector<128x128xbf16>, vector<128x128xf32> -> vector<128x128xf32>
    %c7_63 = arith.constant 7 : index
    %c0_64 = arith.constant 0 : index
    %c0_65 = arith.constant 0 : index
    %87 = vector.load %arg3[%c7_63, %c0_64, %c0_65] : memref<16x1x128xf32, #tpu.memory_space<vmem>>, vector<1x1x128xf32>
    %88 = vector.shape_cast %87 : vector<1x1x128xf32> to vector<1x128xf32>
    %89 = vector.broadcast %88 : vector<1x128xf32> to vector<128x128xf32>
    %90 = arith.addf %86, %89 : vector<128x128xf32>
    %cst_66 = arith.constant 0.000000e+00 : f32
    %91 = vector.broadcast %cst_66 : f32 to vector<128x128xf32>
    %92 = arith.maximumf %90, %91 : vector<128x128xf32>
    %93 = arith.truncf %92 : vector<128x128xf32> to vector<128x128xbf16>
    %c11 = arith.constant 11 : index
    %c0_67 = arith.constant 0 : index
    %c0_68 = arith.constant 0 : index
    %94 = vector.load %arg2[%c11, %c0_67, %c0_68] : memref<17x128x128xbf16, #tpu.memory_space<vmem>>, vector<1x128x128xbf16>
    %95 = vector.shape_cast %94 : vector<1x128x128xbf16> to vector<128x128xbf16>
    %cst_69 = arith.constant dense<0.000000e+00> : vector<128x128xf32>
    %96 = tpu.matmul %93, %95, %cst_69 {dimension_numbers = #tpu.dot_dimension_numbers<[1], [0], [0], [1], [0, 0, 1, 1], [], []>} : vector<128x128xbf16>, vector<128x128xbf16>, vector<128x128xf32> -> vector<128x128xf32>
    %c8_70 = arith.constant 8 : index
    %c0_71 = arith.constant 0 : index
    %c0_72 = arith.constant 0 : index
    %97 = vector.load %arg3[%c8_70, %c0_71, %c0_72] : memref<16x1x128xf32, #tpu.memory_space<vmem>>, vector<1x1x128xf32>
    %98 = vector.shape_cast %97 : vector<1x1x128xf32> to vector<1x128xf32>
    %99 = vector.broadcast %98 : vector<1x128xf32> to vector<128x128xf32>
    %100 = arith.addf %96, %99 : vector<128x128xf32>
    %c12 = arith.constant 12 : index
    %c0_73 = arith.constant 0 : index
    %c0_74 = arith.constant 0 : index
    %101 = vector.load %arg2[%c12, %c0_73, %c0_74] : memref<17x128x128xbf16, #tpu.memory_space<vmem>>, vector<1x128x128xbf16>
    %102 = vector.shape_cast %101 : vector<1x128x128xbf16> to vector<128x128xbf16>
    %cst_75 = arith.constant dense<0.000000e+00> : vector<128x128xf32>
    %103 = tpu.matmul %93, %102, %cst_75 {dimension_numbers = #tpu.dot_dimension_numbers<[1], [0], [0], [1], [0, 0, 1, 1], [], []>} : vector<128x128xbf16>, vector<128x128xbf16>, vector<128x128xf32> -> vector<128x128xf32>
    %104 = arith.truncf %100 : vector<128x128xf32> to vector<128x128xbf16>
    %c13 = arith.constant 13 : index
    %c0_76 = arith.constant 0 : index
    %c0_77 = arith.constant 0 : index
    %105 = vector.load %arg2[%c13, %c0_76, %c0_77] : memref<17x128x128xbf16, #tpu.memory_space<vmem>>, vector<1x128x128xbf16>
    %106 = vector.shape_cast %105 : vector<1x128x128xbf16> to vector<128x128xbf16>
    %cst_78 = arith.constant dense<0.000000e+00> : vector<128x128xf32>
    %107 = tpu.matmul %104, %106, %cst_78 {dimension_numbers = #tpu.dot_dimension_numbers<[1], [0], [0], [1], [0, 0, 1, 1], [], []>} : vector<128x128xbf16>, vector<128x128xbf16>, vector<128x128xf32> -> vector<128x128xf32>
    %c14 = arith.constant 14 : index
    %c0_79 = arith.constant 0 : index
    %c0_80 = arith.constant 0 : index
    %108 = vector.load %arg2[%c14, %c0_79, %c0_80] : memref<17x128x128xbf16, #tpu.memory_space<vmem>>, vector<1x128x128xbf16>
    %109 = vector.shape_cast %108 : vector<1x128x128xbf16> to vector<128x128xbf16>
    %cst_81 = arith.constant dense<0.000000e+00> : vector<128x128xf32>
    %110 = tpu.matmul %0, %109, %cst_81 {dimension_numbers = #tpu.dot_dimension_numbers<[1], [0], [0], [1], [0, 0, 1, 1], [], []>} : vector<128x128xbf16>, vector<128x128xbf16>, vector<128x128xf32> -> vector<128x128xf32>
    %111 = arith.addf %107, %110 : vector<128x128xf32>
    %c15 = arith.constant 15 : index
    %c0_82 = arith.constant 0 : index
    %c0_83 = arith.constant 0 : index
    %112 = vector.load %arg2[%c15, %c0_82, %c0_83] : memref<17x128x128xbf16, #tpu.memory_space<vmem>>, vector<1x128x128xbf16>
    %113 = vector.shape_cast %112 : vector<1x128x128xbf16> to vector<128x128xbf16>
    %cst_84 = arith.constant dense<0.000000e+00> : vector<128x128xf32>
    %114 = tpu.matmul %1, %113, %cst_84 {dimension_numbers = #tpu.dot_dimension_numbers<[1], [0], [0], [1], [0, 0, 1, 1], [], []>} : vector<128x128xbf16>, vector<128x128xbf16>, vector<128x128xf32> -> vector<128x128xf32>
    %115 = arith.addf %111, %114 : vector<128x128xf32>
    %c9_85 = arith.constant 9 : index
    %c0_86 = arith.constant 0 : index
    %c0_87 = arith.constant 0 : index
    %116 = vector.load %arg3[%c9_85, %c0_86, %c0_87] : memref<16x1x128xf32, #tpu.memory_space<vmem>>, vector<1x1x128xf32>
    %117 = vector.shape_cast %116 : vector<1x1x128xf32> to vector<1x128xf32>
    %118 = vector.broadcast %117 : vector<1x128xf32> to vector<128x128xf32>
    %119 = arith.addf %115, %118 : vector<128x128xf32>
    %cst_88 = arith.constant 0.000000e+00 : f32
    %120 = vector.broadcast %cst_88 : f32 to vector<128x128xf32>
    %121 = arith.maximumf %119, %120 : vector<128x128xf32>
    %122 = arith.truncf %121 : vector<128x128xf32> to vector<128x128xbf16>
    %c16 = arith.constant 16 : index
    %c0_89 = arith.constant 0 : index
    %c0_90 = arith.constant 0 : index
    %123 = vector.load %arg2[%c16, %c0_89, %c0_90] : memref<17x128x128xbf16, #tpu.memory_space<vmem>>, vector<1x128x128xbf16>
    %124 = vector.shape_cast %123 : vector<1x128x128xbf16> to vector<128x128xbf16>
    %cst_91 = arith.constant dense<0.000000e+00> : vector<128x128xf32>
    %125 = tpu.matmul %122, %124, %cst_91 {dimension_numbers = #tpu.dot_dimension_numbers<[1], [0], [0], [1], [0, 0, 1, 1], [], []>} : vector<128x128xbf16>, vector<128x128xbf16>, vector<128x128xf32> -> vector<128x128xf32>
    %c10_92 = arith.constant 10 : index
    %c0_93 = arith.constant 0 : index
    %c0_94 = arith.constant 0 : index
    %126 = vector.load %arg3[%c10_92, %c0_93, %c0_94] : memref<16x1x128xf32, #tpu.memory_space<vmem>>, vector<1x1x128xf32>
    %127 = vector.shape_cast %126 : vector<1x1x128xf32> to vector<1x128xf32>
    %128 = vector.broadcast %127 : vector<1x128xf32> to vector<128x128xf32>
    %129 = arith.addf %125, %128 : vector<128x128xf32>
    %130 = vector.extract_strided_slice %129 {offsets = [0, 0], sizes = [128, 8], strides = [1, 1]} : vector<128x128xf32> to vector<128x8xf32>
    %131 = vector.extract_strided_slice %103 {offsets = [0, 0], sizes = [128, 8], strides = [1, 1]} : vector<128x128xf32> to vector<128x8xf32>
    %132 = tpu.iota {dimensions = array<i32: 1>} : vector<128x8xi32>
    %c4_i32 = arith.constant 4 : i32
    %c0_i32 = arith.constant 0 : i32
    %133 = arith.cmpi eq, %c4_i32, %c0_i32 : i32
    %c1_i32 = arith.constant 1 : i32
    %134 = arith.select %133, %c1_i32, %c4_i32 : i32
    %135 = vector.broadcast %134 : i32 to vector<128x8xi32>
    %136 = arith.remsi %132, %135 : vector<128x8xi32>
    %c0_i32_95 = arith.constant 0 : i32
    %137 = vector.broadcast %c0_i32_95 : i32 to vector<128x8xi32>
    %138 = arith.cmpi ne, %136, %137 : vector<128x8xi32>
    %c0_i32_96 = arith.constant 0 : i32
    %139 = vector.broadcast %c0_i32_96 : i32 to vector<128x8xi32>
    %140 = arith.cmpi slt, %136, %139 : vector<128x8xi32>
    %c0_i32_97 = arith.constant 0 : i32
    %141 = arith.cmpi slt, %134, %c0_i32_97 : i32
    %142 = vector.broadcast %141 : i1 to vector<128x8xi1>
    %143 = vector.broadcast %142 : vector<128x8xi1> to vector<128x8xi1>
    %144 = arith.xori %140, %143 : vector<128x8xi1>
    %145 = arith.andi %144, %138 : vector<128x8xi1>
    %146 = vector.broadcast %134 : i32 to vector<128x8xi32>
    %147 = arith.addi %136, %146 : vector<128x8xi32>
    %148 = arith.select %145, %147, %136 : vector<128x8xi1>, vector<128x8xi32>
    %c3_i32 = arith.constant 3 : i32
    %149 = vector.broadcast %c3_i32 : i32 to vector<128x8xi32>
    %150 = arith.cmpi eq, %148, %149 : vector<128x8xi32>
    %cst_98 = arith.constant 0.000000e+00 : f32
    %151 = vector.broadcast %cst_98 : f32 to vector<128x8xf32>
    %152 = arith.maximumf %131, %151 : vector<128x8xf32>
    %153 = arith.negf %130 : vector<128x8xf32>
    %154 = math.exp %153 : vector<128x8xf32>
    %cst_99 = arith.constant 1.000000e+00 : f32
    %155 = vector.broadcast %cst_99 : f32 to vector<128x8xf32>
    %156 = arith.addf %155, %154 : vector<128x8xf32>
    %157 = arith.divf %155, %156 : vector<128x8xf32>
    %158 = arith.select %150, %152, %157 : vector<128x8xi1>, vector<128x8xf32>
    %c0_100 = arith.constant 0 : index
    %c0_101 = arith.constant 0 : index
    %159 = vector.load %arg4[%c0_100, %c0_101] : memref<128x8xf32, #tpu.memory_space<vmem>>, vector<128x8xf32>
    tpu.vector_store %arg4[%c0_100, %c0_101], %158 {strides = array<i32>} : memref<128x8xf32, #tpu.memory_space<vmem>>, vector<128x8xf32>,
    return
  }
  func.func @transform_0(%arg0: i32) -> (i32, i32) {
    %c0_i32 = arith.constant 0 : i32
    %c0_i32_0 = arith.constant 0 : i32
    return %arg0, %c0_i32 : i32, i32
  }
  func.func @transform_1(%arg0: i32) -> (i32, i32, i32) {
    %c0_i32 = arith.constant 0 : i32
    %c0_i32_0 = arith.constant 0 : i32
    %c0_i32_1 = arith.constant 0 : i32
    %c0_i32_2 = arith.constant 0 : i32
    return %c0_i32, %c0_i32_0, %c0_i32_1 : i32, i32, i32
  }
  func.func @transform_2(%arg0: i32) -> (i32, i32, i32) {
    %c0_i32 = arith.constant 0 : i32
    %c0_i32_0 = arith.constant 0 : i32
    %c0_i32_1 = arith.constant 0 : i32
    %c0_i32_2 = arith.constant 0 : i32
    return %c0_i32, %c0_i32_0, %c0_i32_1 : i32, i32, i32
  }
  func.func @transform_3(%arg0: i32) -> (i32, i32) {
    %c0_i32 = arith.constant 0 : i32
    %c0_i32_0 = arith.constant 0 : i32
    return %arg0, %c0_i32 : i32, i32
  }
}

</mosaic_0001>

<bundles_post_ra>
// kernel: tpu_custom_call.1
= control target key start
LH: loop header
LB: loop body
LE: loop exit
PB: predicated region body
PF: predicated region fallthrough
CT: control target
= control target key end

     0   :  { %8 = vsyncpa [#allocation3], 0  ;;  %s5749_s0 = inlined_call_operand.hbm [shape: bf16[512,128], index: 0, kind: input, shape index: {}]   ;;  %s5750_s1 = inlined_call_operand.hbm [shape: bf16[17,128,128], index: 1, kind: input, shape index: {}]   ;;  %s5751_s2 = inlined_call_operand.hbm [shape: f32[16,1,128], index: 2, kind: input, shape index: {}]   ;;  %s5752_s3 = inlined_call_operand.vmem [shape: f32[256,8], index: 3, kind: output, shape index: {}]  }
   0x1   :  { %10 = vsyncpa [#allocation3 + $0x1], 0 }
   0x2   :  { %11 = vsyncpa [#allocation5], 0  ;;  %s5229_s12 = smov 0   ;;  %s5231_s13 = smov 0  }
   0x3   :  { %s5233_s14 = smov 0   ;;  %s5235_s15 = smov 0  }
   0x4 LB: > { %s3741_s16 = sadd.s32 4294967295, %s5200_s15   ;;  %p37_p0 = scmp.ne.s32.totalorder %s5192_s13, %s5188_s12  ;;  %s5200_s15 = sphi %s5235_s15, %s5770_s15   ;;  %s5196_s14 = sphi %s5233_s14, %s5769_s14   ;;  %s5192_s13 = sphi %s5231_s13, %s5768_s13   ;;  %s5188_s12 = sphi %s5229_s12, %s5767_s12  }
   0x5   : > { %p5251_p1 = scmp.eq.s32.totalorder %s3741_s16, 0  ;;  %p3743_p2 = scmp.ge.s32.totalorder %s5200_s15, 1 }
   0x6   : > { %p116_p3 = scmp.lt.s32.totalorder %s5200_s15, 3  ;;  %s5202_s20 = smov [#allocation4]  }
   0x7   : > { %s5757_s17 = scalar_select %p5251_p1, 1, 0 }
   0x8   : > { %p5259_p4 = por %p5251_p1, %p37_p0  ;;  %p5263_p5 = pnand %p3743_p2, %p116_p3 }
   0x9   : > { %s128_s21 = sshll.u32 %s5202_s20, 4  ;;  %s5203_s23 = smov [#allocation6]   ;;  %s129_s21 = int_to_ptr.vmem [resolvable:$true] %s128_s21 }
   0xa   : > { %s5758_s18 = scalar_select %p5259_p4, 1, 0 }
   0xb   : > { %s5759_s19 = scalar_select %p5263_p5, 1, 0 }
   0xc   : > { %p4780_p6 = pneg %p5263_p5  ;;  %s141_s24 = sshll.u32 %s5203_s23, 4  ;;  %s142_s24 = int_to_ptr.vmem [resolvable:$true] %s141_s24 }
   0xd   : > { %s5093_s25 = scalar_lea.vmem %s129_s21, 17408  ;;  %p5101_p12 = scmp.lt.s32.totalorder %s129_s21, %s129_s21 }
   0xe   : > { %p5271_p7 = pnand %p4780_p6, %p5251_p1  ;;  %p5094_p9 = scmp.ne.s32.totalorder %s129_s21, %s5093_s25 }
   0xf   : > { %p5102_p13 = scmp.lt.s32.totalorder %s5093_s25, %s5093_s25 }
  0x10   : > { %p5084_p8 = pneg %p5271_p7 }
  0x11   : > { %p5103_p0 = por %p5102_p13, %p5101_p12 }
  0x12   : > { %p5096_p10 = pnand %p5094_p9, %p5084_p8 }
  0x14   : > { %p5097_p11 = pneg %p5096_p10 }
  0x16   : > { %p5104_p2 = pnand %p5103_p0, %p5097_p11 }
  0x18   : > { %5107 = shalt.err (!%p5104_p2)
}
  0x19   : > { %s5204_s26 = smov 64   ;;  %s5205_s27 = smov 4  }
  0x1a   : > { %4783 = dma.hbm_to_vmem [thread:$0]  (!%p5271_p7), %s5750_s1, 17408, %s129_s21, [#allocation5], %s5204_s26, %s5204_s26, %s5205_s27  }
  0x1b   : > { %s5119_s30 = scalar_lea.vmem %s142_s24, 256  ;;  %p5127_p10 = scmp.lt.s32.totalorder %s142_s24, %s142_s24 }
  0x1c   : > { %p5120_p3 = scmp.ne.s32.totalorder %s142_s24, %s5119_s30  ;;  %p5128_p11 = scmp.lt.s32.totalorder %s5119_s30, %s5119_s30 }
  0x1e   : > { %p5122_p6 = pnand %p5120_p3, %p5084_p8  ;;  %p5129_p12 = por %p5128_p11, %p5127_p10 }
  0x20   : > { %p5123_p9 = pneg %p5122_p6 }
  0x22   : > { %p5130_p13 = pnand %p5129_p12, %p5123_p9 }
  0x24   : > { %5133 = shalt.err (!%p5130_p13)
}
  0x25   : > { %s5206_s4 = smov 16   ;;  %s5207_s5 = smov 1  }
  0x26   : > { %4786 = dma.hbm_to_vmem [thread:$0]  (!%p5271_p7), %s5751_s2, 256, %s142_s24, [#allocation5], %s5206_s4, %s5206_s4, %s5207_s5  }
  0x27   : > { %s5297_s8 = sadd.s32 1, %s5200_s15   ;;  %s24_s10 = sadd.s32 1, %s5196_s14 }
  0x28   : > { %s21_s9 = ssub.s32 %s5200_s15, %s5297_s8  ;;  %p31_p0 = scmp.ne.s32.totalorder %s5196_s14, %s5192_s13 }
  0x29   : > { %p22_p8 = scmp.eq.s32.totalorder %s21_s9, 0  ;;  %p32_p2 = scmp.eq.s32.totalorder %s5200_s15, 0 }
  0x2a   : > { %p4793_p6 = scmp.lt.s32.totalorder %s5200_s15, 2  ;;  %s155_s12 = sand.u32 1, %s5196_s14  }
  0x2b   : > { %s5306_s11 = scalar_select %p22_p8, %s5196_s14, %s24_s10  }
  0x2c   : > { %p33_p3 = por %p32_p2, %p31_p0  ;;  %s3937_s20 = sshll.u32 %s5200_s15, 11 }
  0x2d   : > { %s3747_s21 = sshll.u32 %s155_s12, 7  ;;  %s5314_s25 = scalar_lea.hbm %s5749_s0, %s3937_s20 }
  0x2e   : > { %s159_s24 = scalar_lea.vmem [#allocation2], %s3747_s21  ;;  %p5316_p7 = pnand %p4793_p6, %p33_p3 }
  0x2f   : > { %s166_s28 = sshll.u32 %s159_s24, 4  ;;  %s5322_s30 = scalar_lea.sflag [#allocation3], %s155_s12  ;;  %s5320_s28 = int_to_ptr.vmem [resolvable:$true] %s166_s28 }
  0x30   : > { %s5134_s4 = scalar_lea.hbm %s5314_s25, 2048  ;;  %p5136_p10 = pneg %p5316_p7 }
  0x31   : > { %p5135_p9 = scmp.ne.s32.totalorder %s5314_s25, %s5134_s4  ;;  %s5139_s7 = scalar_lea.hbm %s5749_s0, 4096 }
  0x32   : > { %p5140_p13 = scmp.lt.s32.totalorder %s5314_s25, %s5749_s0  ;;  %p5141_p8 = scmp.lt.s32.totalorder %s5139_s7, %s5134_s4 }
  0x33   : > { %p5137_p11 = pnand %p5136_p10, %p5135_p9 }
  0x34   : > { %p5142_p0 = por %p5141_p8, %p5140_p13 }
  0x35   : > { %p5138_p12 = pneg %p5137_p11 }
  0x37   : > { %p5143_p2 = pnand %p5142_p0, %p5138_p12 }
  0x39   : > { %5146 = shalt.err (!%p5143_p2)
}
  0x3a   : > { %s5147_s12 = scalar_lea.vmem %s5320_s28, 2048  ;;  %s5208_s20 = smov [#allocation2]  }
  0x3b   : > { %p5148_p3 = scmp.ne.s32.totalorder %s5320_s28, %s5147_s12  ;;  %s5152_s21 = sshll.u32 %s5208_s20, 4  ;;  %s5153_s21 = int_to_ptr.vmem [resolvable:$false] %s5152_s21 }
  0x3c   : > { %s5154_s22 = scalar_lea.vmem %s5153_s21, 4096  ;;  %p5155_p11 = scmp.lt.s32.totalorder %s5320_s28, %s5153_s21 }
  0x3d   : > { %p5150_p6 = pnand %p5148_p3, %p5136_p10  ;;  %p5156_p1 = scmp.lt.s32.totalorder %s5154_s22, %s5147_s12 }
  0x3f   : > { %p5151_p9 = pneg %p5150_p6  ;;  %p5157_p4 = por %p5156_p1, %p5155_p11 }
  0x41   : > { %p5158_p5 = pnand %p5157_p4, %p5151_p9 }
  0x43   : > { %5161 = shalt.err (!%p5158_p5)
}
  0x44   : > { %4790 = dma.hbm_to_vmem [thread:$0]  (!%p5316_p7), %s5314_s25, 2048, %s5320_s28, %s5322_s30, %s5204_s26, %s5204_s26, %s5205_s27  }
  0x45   : > { %p5762_p10 = scmp.ne.s32.totalorder %s5759_s19, 0 }
  0x46   : > { %s180_s23 = sand.u32 (!%p5762_p10), 1, %s5192_s13   ;;  %p5763_p1 = scmp.ne.s32.totalorder (!%p5762_p10), %s5758_s18, 0 }
  0x47   : > { %178 = sbr.rel (%p5762_p10) target bundleno = 2443 (0x98b), region = 32  ;;  %s3751_s24 = sshll.u32 (!%p5762_p10), %s180_s23, 7 }
  0x48   : > { %s181_s4 = scalar_lea.sflag (!%p5762_p10), [#allocation3], %s180_s23  ;;  %s5349_s5 = scalar_lea.vmem (!%p5762_p10), [#allocation2], %s3751_s24 }
  0x4c   : > { %5179 = dma.done.wait (%p5763_p1), %s181_s4, 2048  }
  0x4d   : > { %5181 = vsyncadd (%p5763_p1), %s181_s4, 4294965248  ;;  %p5764_p4 = scmp.ne.s32.totalorder %s5757_s17, 0 }
  0x4f   : > { %5183 = dma.done.wait (%p5764_p4), [#allocation5], 17664  }
  0x50   : > { %5185 = vsyncadd (%p5764_p4), [#allocation5], 4294949632  ;;  %v4834_v0 = vld [vmem:[#allocation4 + $0x78] sm:$0xff]   ;;  %v4836_v2 = vld [vmem:[#allocation4 + $0x70] sm:$0xff]   ;;  %s3754_s17 = sshll.u32 %s3741_s16, 4  ;;  %vm3638_vm1 = vcmask 64512  }
  0x51   : > { %v4835_v1 = vld [vmem:[#allocation4 + $0x38] sm:$0xff]   ;;  %4210 = vmatprep.subr.bf16.mxu0 %v4834_v0  ;;  %v4837_v3 = vld [vmem:[#allocation4 + $0x30] sm:$0xff]   ;;  %v4838_v4 = vld [vmem:[#allocation4 + $0x68] sm:$0xff]   ;;  %p217_p5 = scmp.lt.s32.totalorder %s3754_s17, 31 }
  0x52   : > { %4242 = vmatprep.subr.bf16.mxu1 %v4835_v1  ;;  %4211 = vmatpush3.bf16.msra.mxu0 %v4834_v0  ;;  %v4839_v5 = vld [vmem:[#allocation4 + $0x28] sm:$0xff]   ;;  %v4840_v6 = vld [vmem:[#allocation4 + $0x60] sm:$0xff]   ;;  %v4842_v8 = vld [vmem:[#allocation4 + $0x58] sm:$0xff]  }
  0x53   : > { %4243 = vmatpush3.bf16.msra.mxu1 %v4835_v1  ;;  %4212 = vmatprep.subr.bf16.mxu0 %v4836_v2  ;;  %v4841_v7 = vld [vmem:[#allocation4 + $0x20] sm:$0xff]   ;;  %v4843_v9 = vld [vmem:[#allocation4 + $0x18] sm:$0xff]   ;;  %v4844_v10 = vld [vmem:[#allocation4 + $0x50] sm:$0xff]   ;;  %s5772_s17 = smov (!%p217_p5, %s3754_s17), 31 }
  0x54   : > { %4244 = vmatprep.subr.bf16.mxu1 %v4837_v3  ;;  %v4845_v11 = vld [vmem:[#allocation4 + $0x10] sm:$0xff]   ;;  %v4850_v12 = vld [vmem:[%s5349_s5 + $0x40] sm:$0xff]   ;;  %v4846_v14 = vld [vmem:[#allocation4 + $0x48] sm:$0xff]   ;;  %s3755_s15 = sshll.u32 %s5772_s17, 3 }
  0x55   : > { %v4851_v13 = vld [vmem:[%s5349_s5] sm:$0xff]   ;;  %4226 = vmatprep.mubr.bf16.mxu0 %v4850_v12  ;;  %v4847_v15 = vld [vmem:[#allocation4 + $0x8] sm:$0xff]   ;;  %v4854_v20 = vld [vmem:[%s5349_s5 + $0x50] sm:$0xff]   ;;  %s5654_s19 = scalar_lea.vmem %s5752_s3, %s3755_s15 }
  0x56   : > { %4213 = vmatpush3.bf16.msra.mxu0 %v4836_v2  ;;  %4258 = vmatprep.mubr.bf16.mxu1 %v4851_v13  ;;  %v4848_v16 = vld [vmem:[#allocation4 + $0x40] sm:$0xff]   ;;  %v4852_v18 = vld [vmem:[%s5349_s5 + $0x48] sm:$0xff]   ;;  %v4855_v21 = vld [vmem:[%s5349_s5 + $0x10] sm:$0xff]  }
  0x57   : > { %4245 = vmatpush3.bf16.msra.mxu1 %v4837_v3  ;;  %4214 = vmatprep.subr.bf16.mxu0 %v4838_v4  ;;  %v4849_v17 = vld [vmem:[#allocation4] sm:$0xff]   ;;  %v4853_v19 = vld [vmem:[%s5349_s5 + $0x8] sm:$0xff]   ;;  %v4866_v22 = vld [vmem:[#allocation4 + $0xb8] sm:$0xff]  }
  0x58   : > { %4246 = vmatprep.subr.bf16.mxu1 %v4839_v5  ;;  %v4867_v23 = vld [vmem:[#allocation4 + $0xb0] sm:$0xff]   ;;  %v4856_v24 = vld [vmem:[%s5349_s5 + $0x58] sm:$0xff]   ;;  %v4868_v25 = vld [vmem:[#allocation4 + $0xa8] sm:$0xff]  }
  0x59   : > { %v4857_v26 = vld [vmem:[%s5349_s5 + $0x18] sm:$0xff]   ;;  %v4858_v27 = vld [vmem:[%s5349_s5 + $0x60] sm:$0xff]   ;;  %v4860_v31 = vld [vmem:[%s5349_s5 + $0x68] sm:$0xff]  }
  0x5a   : > { %4215 = vmatpush3.bf16.msra.mxu0 %v4838_v4  ;;  %v4859_v28 = vld [vmem:[%s5349_s5 + $0x20] sm:$0xff]   ;;  %v4870_v30 = vld [vmem:[#allocation4 + $0x98] sm:$0xff]   ;;  %v4861_v32 = vld [vmem:[%s5349_s5 + $0x28] sm:$0xff]  }
  0x5b   : > { %4247 = vmatpush3.bf16.msra.mxu1 %v4839_v5  ;;  %4216 = vmatprep.subr.bf16.mxu0 %v4840_v6  ;;  %v4869_v29 = vld [vmem:[#allocation4 + $0xa0] sm:$0xff]   ;;  %v4862_v33 = vld [vmem:[%s5349_s5 + $0x70] sm:$0xff]   ;;  %v4864_v35 = vld [vmem:[%s5349_s5 + $0x78] sm:$0xff]  }
  0x5c   : > { %4248 = vmatprep.subr.bf16.mxu1 %v4841_v7  ;;  %v4863_v34 = vld [vmem:[%s5349_s5 + $0x30] sm:$0xff]   ;;  %v4865_v36 = vld [vmem:[%s5349_s5 + $0x38] sm:$0xff]   ;;  %v4872_v38 = vld [vmem:[#allocation4 + $0x88] sm:$0xff]  }
  0x5d   : > { %v4871_v37 = vld [vmem:[#allocation4 + $0x90] sm:$0xff]   ;;  %v4873_v39 = vld [vmem:[#allocation4 + $0x80] sm:$0xff]   ;;  %v4874_v40 = vld [vmem:[#allocation4 + $0xf8] sm:$0xff]  }
  0x5e   : > { %4217 = vmatpush3.bf16.msra.mxu0 %v4840_v6  ;;  %v4875_v41 = vld [vmem:[#allocation4 + $0xf0] sm:$0xff]   ;;  %v4876_v42 = vld [vmem:[#allocation4 + $0xe8] sm:$0xff]   ;;  %v4877_v43 = vld [vmem:[#allocation4 + $0xe0] sm:$0xff]  }
  0x5f   : > { %4249 = vmatpush3.bf16.msra.mxu1 %v4841_v7  ;;  %4218 = vmatprep.subr.bf16.mxu0 %v4842_v8  ;;  %v4878_v44 = vld [vmem:[#allocation4 + $0xd8] sm:$0xff]   ;;  %v5375_v53 = vld [vmem:[#allocation6] ss:$0 sm:$0xff] }
  0x60   : > { %4250 = vmatprep.subr.bf16.mxu1 %v4843_v9 }
  0x62   : > { %4219 = vmatpush3.bf16.msra.mxu0 %v4842_v8 }
  0x63   : > { %4251 = vmatpush3.bf16.msra.mxu1 %v4843_v9  ;;  %4220 = vmatprep.subr.bf16.mxu0 %v4844_v10 }
  0x64   : > { %4252 = vmatprep.subr.bf16.mxu1 %v4845_v11 }
  0x66   : > { %4221 = vmatpush3.bf16.msra.mxu0 %v4844_v10 }
  0x67   : > { %4253 = vmatpush3.bf16.msra.mxu1 %v4845_v11  ;;  %4222 = vmatprep.subr.bf16.mxu0 %v4846_v14 }
  0x68   : > { %4254 = vmatprep.subr.bf16.mxu1 %v4847_v15 }
  0x6a   : > { %4223 = vmatpush3.bf16.msra.mxu0 %v4846_v14 }
  0x6b   : > { %4255 = vmatpush3.bf16.msra.mxu1 %v4847_v15  ;;  %4224 = vmatprep.subr.bf16.mxu0 %v4848_v16 }
  0x6c   : > { %4256 = vmatprep.subr.bf16.mxu1 %v4849_v17 }
  0x6e   : > { %4225 = vmatpush3.bf16.msra.mxu0 %v4848_v16 }
  0x6f   : > { %4257 = vmatpush3.bf16.msra.mxu1 %v4849_v17  ;;  %4274 = vmatprep.subr.bf16.mxu0 %v4866_v22 }
  0x70   : > { %4306 = vmatprep.subr.bf16.mxu1 %v4874_v40 }
  0x71   : > { %4227 = vmatmul.mubr.bf16.vlgmr.msra.gmra.mxu0 %v4852_v18 }
  0x72   : > { %4259 = vmatmul.mubr.bf16.vlgmr.msra.gmra.mxu1 %v4853_v19  ;;  %4230 = vmatprep.mubr.bf16.mxu0 %v4854_v20 }
  0x73   : > { %4262 = vmatprep.mubr.bf16.mxu1 %v4855_v21  ;;  %4275 = vmatpush3.bf16.msra.mxu0 %v4866_v22 }
  0x74   : > { %4276 = vmatprep.subr.bf16.mxu0 %v4867_v23  ;;  %4307 = vmatpush3.bf16.msra.mxu1 %v4874_v40 }
  0x75   : > { %4308 = vmatprep.subr.bf16.mxu1 %v4875_v41 }
  0x77   : > { %4277 = vmatpush3.bf16.msra.mxu0 %v4867_v23 }
  0x78   : > { %4278 = vmatprep.subr.bf16.mxu0 %v4868_v25  ;;  %4309 = vmatpush3.bf16.msra.mxu1 %v4875_v41 }
  0x79   : > { %4231 = vmatmul.mubr.bf16.gmra.mxu0 %v4856_v24  ;;  %4310 = vmatprep.subr.bf16.mxu1 %v4876_v42 }
  0x7a   : > { %4263 = vmatmul.mubr.bf16.gmra.mxu1 %v4857_v26  ;;  %4234 = vmatprep.mubr.bf16.mxu0 %v4858_v27 }
  0x7b   : > { %4266 = vmatprep.mubr.bf16.mxu1 %v4859_v28  ;;  %4279 = vmatpush3.bf16.msra.mxu0 %v4868_v25 }
  0x7c   : > { %4280 = vmatprep.subr.bf16.mxu0 %v4869_v29  ;;  %4311 = vmatpush3.bf16.msra.mxu1 %v4876_v42 }
  0x7d   : > { %4312 = vmatprep.subr.bf16.mxu1 %v4877_v43 }
  0x7f   : > { %4281 = vmatpush3.bf16.msra.mxu0 %v4869_v29 }
  0x80   : > { %4282 = vmatprep.subr.bf16.mxu0 %v4870_v30  ;;  %4313 = vmatpush3.bf16.msra.mxu1 %v4877_v43 }
  0x81   : > { %4235 = vmatmul.mubr.bf16.gmra.mxu0 %v4860_v31  ;;  %4314 = vmatprep.subr.bf16.mxu1 %v4878_v44 }
  0x82   : > { %4267 = vmatmul.mubr.bf16.gmra.mxu1 %v4861_v32  ;;  %4238 = vmatprep.mubr.bf16.mxu0 %v4862_v33 }
  0x83   : > { %4270 = vmatprep.mubr.bf16.mxu1 %v4863_v34  ;;  %4283 = vmatpush3.bf16.msra.mxu0 %v4870_v30 }
  0x84   : > { %4284 = vmatprep.subr.bf16.mxu0 %v4871_v37  ;;  %4315 = vmatpush3.bf16.msra.mxu1 %v4878_v44 }
  0x87   : > { %4285 = vmatpush3.bf16.msra.mxu0 %v4871_v37 }
  0x88   : > { %4286 = vmatprep.subr.bf16.mxu0 %v4872_v38 }
  0x89   : > { %4239 = vmatmul.mubr.bf16.gmra.mxu0 %v4864_v35 }
  0x8a   : > { %4271 = vmatmul.mubr.bf16.gmra.mxu1 %v4865_v36 }
  0x8b   : > { %4287 = vmatpush3.bf16.msra.mxu0 %v4872_v38 }
  0x8c   : > { %4288 = vmatprep.subr.bf16.mxu0 %v4873_v39 }
  0x8f   : > { %4289 = vmatpush3.bf16.msra.mxu0 %v4873_v39 }
 0x131   : > { %v4228_v45 = vpop.f32.mrf.mxu0 }
 0x132   : > { %v4260_v46 = vpop.f32.mrf.mxu1 }
 0x133   : > { %v418_v47 = vpop.f32.mrf.mxu0  ;;  %v620_v51 = vadd.f32 %v4260_v46, %v4228_v45 }
 0x134   : > { %v611_v48 = vpop.f32.mrf.mxu1 }
 0x135   : > { %v612_v49 = vadd.f32 %v611_v48, %v418_v47  ;;  %v4229_v50 = vpop.f32.mrf.mxu0  ;;  %v683_v61 = vadd.f32 %v5375_v53, %v620_v51 }
 0x136   : > { %v4261_v52 = vpop.f32.mrf.mxu1 }
 0x137   : > { %v623_v54 = vadd.f32 %v4261_v52, %v4229_v50  ;;  %v421_v55 = vpop.f32.mrf.mxu0  ;;  %v681_v57 = vadd.f32 %v5375_v53, %v612_v49  ;;  %v699_v7 = vmax.f32 %v683_v61, 0.0 }
 0x138   : > { %v614_v56 = vpop.f32.mrf.mxu1 }
 0x139   : > { %v684_v58 = vadd.f32 %v5375_v53, %v623_v54  ;;  %v615_v59 = vadd.f32 %v614_v56, %v421_v55  ;;  %v4232_v60 = vpop.f32.mrf.mxu0  ;;  %v697_v3 = vmax.f32 %v681_v57, 0.0 }
 0x13a   : > { %v4264_v62 = vpop.f32.mrf.mxu1 }
 0x13b   : > { %v682_v63 = vadd.f32 %v5375_v53, %v615_v59  ;;  %v434_v0 = vpop.f32.mrf.mxu0  ;;  %v700_v1 = vmax.f32 %v684_v58, 0.0  ;;  %v636_v8 = vadd.f32 %v4264_v62, %v4232_v60 }
 0x13c   : > { %v627_v2 = vpop.f32.mrf.mxu1 }
 0x13d   : > { %v698_v4 = vmax.f32 %v682_v63, 0.0  ;;  %v628_v5 = vadd.f32 %v627_v2, %v434_v0  ;;  %v4233_v6 = vpop.f32.mrf.mxu0  ;;  %v714_v13 = vpack.c.bf16 %v700_v1, %v699_v7  ;;  %v687_v19 = vadd.f32 %v5375_v53, %v636_v8  ;;  %v4879_v7 = vld [vmem:[#allocation4 + $0xd0] sm:$0xff]   ;;  %v4880_v8 = vld [vmem:[#allocation4 + $0xc8] sm:$0xff]  }
 0x13e   : > { %v4265_v9 = vpop.f32.mrf.mxu1  ;;  %4316 = vmatprep.subr.bf16.mxu1 %v4879_v7 }
 0x13f   : > { %v639_v10 = vadd.f32 %v4265_v9, %v4233_v6  ;;  %v437_v11 = vpop.f32.mrf.mxu0  ;;  %v713_v12 = vpack.c.bf16 %v698_v4, %v697_v3  ;;  %v685_v15 = vadd.f32 %v5375_v53, %v628_v5  ;;  %v703_v29 = vmax.f32 %v687_v19, 0.0  ;;  %4317 = vmatpush3.bf16.msra.mxu1 %v4879_v7  ;;  %v4881_v9 = vld [vmem:[#allocation4 + $0xc0] sm:$0xff]  }
 0x140   : > { %v630_v14 = vpop.f32.mrf.mxu1  ;;  %4318 = vmatprep.subr.bf16.mxu1 %v4880_v8 }
 0x141   : > { %v688_v16 = vadd.f32 %v5375_v53, %v639_v10  ;;  %v631_v17 = vadd.f32 %v630_v14, %v437_v11  ;;  %4290 = vmatprep.mubr.bf16.mxu0 %v713_v12  ;;  %v4236_v18 = vpop.f32.mrf.mxu0  ;;  %v701_v25 = vmax.f32 %v685_v15, 0.0  ;;  %v4882_v10 = vld [vmem:[#allocation4 + $0x138] sm:$0xff]   ;;  %v4883_v11 = vld [vmem:[#allocation4 + $0x130] sm:$0xff]   ;;  %v4885_v12 = vld [vmem:[#allocation4 + $0x120] sm:$0xff]  }
 0x142   : > { %v4268_v20 = vpop.f32.mrf.mxu1  ;;  %4291 = vmatmul.mubr.bf16.vlgmr.msra.gmra.mxu0 %v714_v13  ;;  %4338 = vmatprep.subr.bf16.mxu0 %v4882_v10  ;;  %v4886_v13 = vld [vmem:[#allocation4 + $0x118] sm:$0xff]  }
 0x143   : > { %v686_v21 = vadd.f32 %v5375_v53, %v631_v17  ;;  %v450_v22 = vpop.f32.mrf.mxu0  ;;  %v704_v23 = vmax.f32 %v688_v16, 0.0  ;;  %v652_v30 = vadd.f32 %v4268_v20, %v4236_v18  ;;  %4319 = vmatpush3.bf16.msra.mxu1 %v4880_v8  ;;  %4339 = vmatpush3.bf16.msra.mxu0 %v4882_v10  ;;  %v3789_v16 = vld [vmem:[#allocation6 + $0x1] ss:$0 sm:$0xff]  ;;  %v4887_v8 = vld [vmem:[#allocation4 + $0x110] sm:$0xff]  }
 0x144   : > { %v643_v24 = vpop.f32.mrf.mxu1  ;;  %4320 = vmatprep.subr.bf16.mxu1 %v4881_v9  ;;  %4340 = vmatprep.subr.bf16.mxu0 %v4883_v11  ;;  %v4889_v10 = vld [vmem:[#allocation4 + $0x100] sm:$0xff]  }
 0x145   : > { %v702_v26 = vmax.f32 %v686_v21, 0.0  ;;  %v644_v27 = vadd.f32 %v643_v24, %v450_v22  ;;  %v4237_v28 = vpop.f32.mrf.mxu0  ;;  %v716_v36 = vpack.c.bf16 %v704_v23, %v703_v29  ;;  %v691_v41 = vadd.f32 %v5375_v53, %v652_v30 }
 0x146   : > { %v4269_v31 = vpop.f32.mrf.mxu1 }
 0x147   : > { %v655_v32 = vadd.f32 %v4269_v31, %v4237_v28  ;;  %v453_v33 = vpop.f32.mrf.mxu0  ;;  %v715_v34 = vpack.c.bf16 %v702_v26, %v701_v25  ;;  %v689_v37 = vadd.f32 %v5375_v53, %v644_v27  ;;  %v707_v51 = vmax.f32 %v691_v41, 0.0  ;;  %4321 = vmatpush3.bf16.msra.mxu1 %v4881_v9  ;;  %4341 = vmatpush3.bf16.msra.mxu0 %v4883_v11  ;;  %v4888_v9 = vld [vmem:[#allocation4 + $0x108] sm:$0xff]   ;;  %v4890_v11 = vld [vmem:[#allocation4 + $0x178] sm:$0xff]  }
 0x148   : > { %v646_v35 = vpop.f32.mrf.mxu1  ;;  %4370 = vmatprep.subr.bf16.mxu1 %v4890_v11 }
 0x149   : > { %v692_v38 = vadd.f32 %v5375_v53, %v655_v32  ;;  %v647_v39 = vadd.f32 %v646_v35, %v453_v33  ;;  %4294 = vmatprep.mubr.bf16.mxu0 %v715_v34  ;;  %v4240_v40 = vpop.f32.mrf.mxu0  ;;  %v705_v47 = vmax.f32 %v689_v37, 0.0 }
 0x14a   : > { %v4272_v42 = vpop.f32.mrf.mxu1  ;;  %4295 = vmatmul.mubr.bf16.gmra.mxu0 %v716_v36 }
 0x14b   : > { %v690_v43 = vadd.f32 %v5375_v53, %v647_v39  ;;  %v466_v44 = vpop.f32.mrf.mxu0  ;;  %v708_v45 = vmax.f32 %v692_v38, 0.0  ;;  %v668_v52 = vadd.f32 %v4272_v42, %v4240_v40 }
 0x14c   : > { %v659_v46 = vpop.f32.mrf.mxu1 }
 0x14d   : > { %v706_v48 = vmax.f32 %v690_v43, 0.0  ;;  %v660_v49 = vadd.f32 %v659_v46, %v466_v44  ;;  %v4241_v50 = vpop.f32.mrf.mxu0  ;;  %v718_v59 = vpack.c.bf16 %v708_v45, %v707_v51  ;;  %v695_v63 = vadd.f32 %v5375_v53, %v668_v52 }
 0x14e   : > { %v4273_v54 = vpop.f32.mrf.mxu1 }
 0x14f   : > { %v671_v55 = vadd.f32 %v4273_v54, %v4241_v50  ;;  %v469_v56 = vpop.f32.mrf.mxu0  ;;  %v717_v57 = vpack.c.bf16 %v706_v48, %v705_v47  ;;  %v693_v60 = vadd.f32 %v5375_v53, %v660_v49  ;;  %v711_v4 = vmax.f32 %v695_v63, 0.0 }
 0x150   : > { %v662_v58 = vpop.f32.mrf.mxu1 }
 0x151   : > { %v696_v61 = vadd.f32 %v5375_v53, %v671_v55  ;;  %v663_v62 = vadd.f32 %v662_v58, %v469_v56  ;;  %4298 = vmatprep.mubr.bf16.mxu0 %v717_v57  ;;  %v709_v2 = vmax.f32 %v693_v60, 0.0 }
 0x152   : > { %4299 = vmatmul.mubr.bf16.gmra.mxu0 %v718_v59 }
 0x153   : > { %v694_v0 = vadd.f32 %v5375_v53, %v663_v62  ;;  %v712_v1 = vmax.f32 %v696_v61, 0.0  ;;  %v4884_v53 = vld [vmem:[#allocation4 + $0x128] sm:$0xff]  }
 0x154   : > { %4342 = vmatprep.subr.bf16.mxu0 %v4884_v53 }
 0x155   : > { %v710_v3 = vmax.f32 %v694_v0, 0.0  ;;  %v720_v6 = vpack.c.bf16 %v712_v1, %v711_v4  ;;  %4343 = vmatpush3.bf16.msra.mxu0 %v4884_v53  ;;  %v4891_v53 = vld [vmem:[#allocation4 + $0x170] sm:$0xff]  }
 0x156   : > { %4344 = vmatprep.subr.bf16.mxu0 %v4885_v12 }
 0x157   : > { %v719_v5 = vpack.c.bf16 %v710_v3, %v709_v2 }
 0x159   : > { %4302 = vmatprep.mubr.bf16.mxu0 %v719_v5  ;;  %4345 = vmatpush3.bf16.msra.mxu0 %v4885_v12  ;;  %v4892_v12 = vld [vmem:[#allocation4 + $0x168] sm:$0xff]  }
 0x15a   : > { %4303 = vmatmul.mubr.bf16.gmra.mxu0 %v720_v6  ;;  %4346 = vmatprep.subr.bf16.mxu0 %v4886_v13 }
 0x15d   : > { %4347 = vmatpush3.bf16.msra.mxu0 %v4886_v13  ;;  %v4893_v13 = vld [vmem:[#allocation4 + $0x160] sm:$0xff]  }
 0x15e   : > { %4348 = vmatprep.subr.bf16.mxu0 %v4887_v8 }
 0x161   : > { %4349 = vmatpush3.bf16.msra.mxu0 %v4887_v8 }
 0x162   : > { %4350 = vmatprep.subr.bf16.mxu0 %v4888_v9 }
 0x165   : > { %4351 = vmatpush3.bf16.msra.mxu0 %v4888_v9  ;;  %v5050_v9 = vld [vmem:[%s5349_s5] sm:$0xff]  }
 0x166   : > { %4352 = vmatprep.subr.bf16.mxu0 %v4889_v10 }
 0x169   : > { %4353 = vmatpush3.bf16.msra.mxu0 %v4889_v10  ;;  %v4895_v10 = vld [vmem:[#allocation4 + $0x150] sm:$0xff]  }
 0x202   : > { %v4292_v14 = vpop.f32.mrf.mxu0 }
 0x203   : > { %v837_v20 = vadd.f32 %v4292_v14, %v3789_v16  ;;  %v4894_v14 = vld [vmem:[#allocation4 + $0x158] sm:$0xff]  }
 0x204   : > { %v828_v15 = vpop.f32.mrf.mxu0 }
 0x205   : > { %v829_v18 = vadd.f32 %v3789_v16, %v828_v15  ;;  %v893_v27 = vmax.f32 %v837_v20, 0.0 }
 0x206   : > { %v4293_v17 = vpop.f32.mrf.mxu0 }
 0x207   : > { %v840_v19 = vadd.f32 %v4293_v17, %v3789_v16  ;;  %v891_v25 = vmax.f32 %v829_v18, 0.0  ;;  %v3798_v17 = vld [vmem:[#allocation6 + $0x2] ss:$0 sm:$0xff] }
 0x208   : > { %v831_v21 = vpop.f32.mrf.mxu0 }
 0x209   : > { %v832_v22 = vadd.f32 %v3789_v16, %v831_v21  ;;  %v894_v23 = vmax.f32 %v840_v19, 0.0 }
 0x20a   : > { %v4296_v24 = vpop.f32.mrf.mxu0 }
 0x20b   : > { %v892_v26 = vmax.f32 %v832_v22, 0.0  ;;  %v908_v30 = vpack.c.bf16 %v894_v23, %v893_v27  ;;  %v853_v34 = vadd.f32 %v4296_v24, %v3789_v16 }
 0x20c   : > { %v844_v28 = vpop.f32.mrf.mxu0 }
 0x20d   : > { %v907_v29 = vpack.c.bf16 %v892_v26, %v891_v25  ;;  %v845_v32 = vadd.f32 %v3789_v16, %v844_v28  ;;  %v897_v41 = vmax.f32 %v853_v34, 0.0 }
 0x20e   : > { %v4297_v31 = vpop.f32.mrf.mxu0 }
 0x20f   : > { %v856_v33 = vadd.f32 %v4297_v31, %v3789_v16  ;;  %4322 = vmatprep.mubr.bf16.mxu1 %v907_v29  ;;  %v895_v39 = vmax.f32 %v845_v32, 0.0 }
 0x210   : > { %v847_v35 = vpop.f32.mrf.mxu0  ;;  %4323 = vmatmul.mubr.bf16.vlgmr.msra.gmra.mxu1 %v908_v30 }
 0x211   : > { %v848_v36 = vadd.f32 %v3789_v16, %v847_v35  ;;  %v898_v37 = vmax.f32 %v856_v33, 0.0  ;;  %4371 = vmatpush3.bf16.msra.mxu1 %v4890_v11  ;;  %v4896_v11 = vld [vmem:[#allocation4 + $0x148] sm:$0xff]  }
 0x212   : > { %v4300_v38 = vpop.f32.mrf.mxu0  ;;  %4372 = vmatprep.subr.bf16.mxu1 %v4891_v53 }
 0x213   : > { %v896_v40 = vmax.f32 %v848_v36, 0.0  ;;  %v910_v44 = vpack.c.bf16 %v898_v37, %v897_v41  ;;  %v869_v48 = vadd.f32 %v4300_v38, %v3789_v16 }
 0x214   : > { %v860_v42 = vpop.f32.mrf.mxu0 }
 0x215   : > { %v909_v43 = vpack.c.bf16 %v896_v40, %v895_v39  ;;  %v861_v46 = vadd.f32 %v3789_v16, %v860_v42  ;;  %v901_v56 = vmax.f32 %v869_v48, 0.0  ;;  %4373 = vmatpush3.bf16.msra.mxu1 %v4891_v53  ;;  %v4897_v53 = vld [vmem:[#allocation4 + $0x140] sm:$0xff]  }
 0x216   : > { %v4301_v45 = vpop.f32.mrf.mxu0  ;;  %4374 = vmatprep.subr.bf16.mxu1 %v4892_v12 }
 0x217   : > { %v872_v47 = vadd.f32 %v4301_v45, %v3789_v16  ;;  %4326 = vmatprep.mubr.bf16.mxu1 %v909_v43  ;;  %v899_v54 = vmax.f32 %v861_v46, 0.0 }
 0x218   : > { %v863_v49 = vpop.f32.mrf.mxu0  ;;  %4327 = vmatmul.mubr.bf16.gmra.mxu1 %v910_v44 }
 0x219   : > { %v864_v50 = vadd.f32 %v3789_v16, %v863_v49  ;;  %v902_v51 = vmax.f32 %v872_v47, 0.0  ;;  %4375 = vmatpush3.bf16.msra.mxu1 %v4892_v12  ;;  %v4898_v12 = vld [vmem:[#allocation4 + $0x1f8] sm:$0xff]  }
 0x21a   : > { %v4304_v52 = vpop.f32.mrf.mxu0  ;;  %4376 = vmatprep.subr.bf16.mxu1 %v4893_v13  ;;  %4402 = vmatprep.subr.bf16.mxu0 %v4898_v12 }
 0x21b   : > { %v900_v55 = vmax.f32 %v864_v50, 0.0  ;;  %v912_v59 = vpack.c.bf16 %v902_v51, %v901_v56  ;;  %v885_v63 = vadd.f32 %v4304_v52, %v3789_v16 }
 0x21c   : > { %v876_v57 = vpop.f32.mrf.mxu0 }
 0x21d   : > { %v911_v58 = vpack.c.bf16 %v900_v55, %v899_v54  ;;  %v877_v61 = vadd.f32 %v3789_v16, %v876_v57  ;;  %v905_v5 = vmax.f32 %v885_v63, 0.0  ;;  %4377 = vmatpush3.bf16.msra.mxu1 %v4893_v13  ;;  %v4899_v13 = vld [vmem:[#allocation4 + $0x1f0] sm:$0xff]  }
 0x21e   : > { %v4305_v60 = vpop.f32.mrf.mxu0  ;;  %4378 = vmatprep.subr.bf16.mxu1 %v4894_v14 }
 0x21f   : > { %v888_v62 = vadd.f32 %v4305_v60, %v3789_v16  ;;  %4330 = vmatprep.mubr.bf16.mxu1 %v911_v58  ;;  %v903_v3 = vmax.f32 %v877_v61, 0.0 }
 0x220   : > { %v879_v0 = vpop.f32.mrf.mxu0  ;;  %4331 = vmatmul.mubr.bf16.gmra.mxu1 %v912_v59 }
 0x221   : > { %v880_v1 = vadd.f32 %v3789_v16, %v879_v0  ;;  %v906_v2 = vmax.f32 %v888_v62, 0.0  ;;  %4379 = vmatpush3.bf16.msra.mxu1 %v4894_v14  ;;  %v5394_v14 = vld [vmem:[#allocation4 + $0x1b8] sm:$0xff]  }
 0x222   : > { %4380 = vmatprep.subr.bf16.mxu1 %v4895_v10 }
 0x223   : > { %v904_v4 = vmax.f32 %v880_v1, 0.0  ;;  %v914_v7 = vpack.c.bf16 %v906_v2, %v905_v5 }
 0x225   : > { %v913_v6 = vpack.c.bf16 %v904_v4, %v903_v3  ;;  %4381 = vmatpush3.bf16.msra.mxu1 %v4895_v10 }
 0x226   : > { %4382 = vmatprep.subr.bf16.mxu1 %v4896_v11 }
 0x227   : > { %4334 = vmatprep.mubr.bf16.mxu1 %v913_v6 }
 0x228   : > { %4335 = vmatmul.mubr.bf16.gmra.mxu1 %v914_v7 }
 0x229   : > { %4383 = vmatpush3.bf16.msra.mxu1 %v4896_v11 }
 0x22a   : > { %4384 = vmatprep.subr.bf16.mxu1 %v4897_v53 }
 0x22d   : > { %4385 = vmatpush3.bf16.msra.mxu1 %v4897_v53 }
 0x22e   : > { %4434 = vmatprep.subr.bf16.mxu1 %v5394_v14 }
 0x2d0   : > { %v4324_v15 = vpop.f32.mrf.mxu1 }
 0x2d1   : > { %v1031_v21 = vadd.f32 %v4324_v15, %v3798_v17  ;;  %v4900_v15 = vld [vmem:[#allocation4 + $0x1e8] sm:$0xff]  }
 0x2d2   : > { %v1022_v16 = vpop.f32.mrf.mxu1 }
 0x2d3   : > { %v1023_v19 = vadd.f32 %v3798_v17, %v1022_v16  ;;  %v1087_v28 = vmax.f32 %v1031_v21, 0.0  ;;  %v4901_v16 = vld [vmem:[#allocation4 + $0x1e0] sm:$0xff]   ;;  %v4906_v21 = vld [vmem:[#allocation4 + $0x238] sm:$0xff]  }
 0x2d4   : > { %v4325_v18 = vpop.f32.mrf.mxu1 }
 0x2d5   : > { %v1034_v20 = vadd.f32 %v4325_v18, %v3798_v17  ;;  %v1085_v26 = vmax.f32 %v1023_v19, 0.0  ;;  %v4903_v18 = vld [vmem:[#allocation4 + $0x1d0] sm:$0xff]   ;;  %v4904_v19 = vld [vmem:[#allocation4 + $0x1c8] sm:$0xff]  }
 0x2d6   : > { %v1025_v22 = vpop.f32.mrf.mxu1 }
 0x2d7   : > { %v1026_v23 = vadd.f32 %v3798_v17, %v1025_v22  ;;  %v1088_v24 = vmax.f32 %v1034_v20, 0.0  ;;  %v4905_v20 = vld [vmem:[#allocation4 + $0x1c0] sm:$0xff]   ;;  %v4908_v22 = vld [vmem:[#allocation4 + $0x230] sm:$0xff]  }
 0x2d8   : > { %v4328_v25 = vpop.f32.mrf.mxu1 }
 0x2d9   : > { %v1086_v27 = vmax.f32 %v1026_v23, 0.0  ;;  %v1102_v31 = vpack.c.bf16 %v1088_v24, %v1087_v28  ;;  %v1047_v35 = vadd.f32 %v4328_v25, %v3798_v17  ;;  %v5051_v23 = vld [vmem:[%s5349_s5 + $0x8] sm:$0xff]   ;;  %v5052_v24 = vld [vmem:[%s5349_s5 + $0x10] sm:$0xff]   ;;  %v5054_v28 = vld [vmem:[%s5349_s5 + $0x20] sm:$0xff]  }
 0x2da   : > { %v1038_v29 = vpop.f32.mrf.mxu1  ;;  %v4910_v25 = vld [vmem:[#allocation4 + $0x228] sm:$0xff]  }
 0x2db   : > { %v1101_v30 = vpack.c.bf16 %v1086_v27, %v1085_v26  ;;  %v1039_v33 = vadd.f32 %v3798_v17, %v1038_v29  ;;  %v1091_v42 = vmax.f32 %v1047_v35, 0.0  ;;  %v4912_v26 = vld [vmem:[#allocation4 + $0x220] sm:$0xff]   ;;  %v5053_v27 = vld [vmem:[%s5349_s5 + $0x18] sm:$0xff]  }
 0x2dc   : > { %v4329_v32 = vpop.f32.mrf.mxu1  ;;  %v4914_v29 = vld [vmem:[#allocation4 + $0x218] sm:$0xff]  }
 0x2dd   : > { %v1050_v34 = vadd.f32 %v4329_v32, %v3798_v17  ;;  %4354 = vmatprep.mubr.bf16.mxu0 %v1101_v30  ;;  %v1089_v40 = vmax.f32 %v1039_v33, 0.0  ;;  %v4916_v30 = vld [vmem:[#allocation4 + $0x210] sm:$0xff]   ;;  %v5057_v33 = vld [vmem:[%s5349_s5 + $0x38] sm:$0xff]  }
 0x2de   : > { %v1041_v36 = vpop.f32.mrf.mxu1  ;;  %4355 = vmatmul.mubr.bf16.vlgmr.msra.gmra.mxu0 %v1102_v31  ;;  %v5055_v31 = vld [vmem:[%s5349_s5 + $0x28] sm:$0xff]   ;;  %v5056_v32 = vld [vmem:[%s5349_s5 + $0x30] sm:$0xff]  }
 0x2df   : > { %v1042_v37 = vadd.f32 %v3798_v17, %v1041_v36  ;;  %v1092_v38 = vmax.f32 %v1050_v34, 0.0  ;;  %4403 = vmatpush3.bf16.msra.mxu0 %v4898_v12  ;;  %v5058_v34 = vld [vmem:[%s5349_s5 + $0x40] sm:$0xff]  }
 0x2e0   : > { %v4332_v39 = vpop.f32.mrf.mxu1  ;;  %4404 = vmatprep.subr.bf16.mxu0 %v4899_v13 }
 0x2e1   : > { %v1090_v41 = vmax.f32 %v1042_v37, 0.0  ;;  %v1104_v45 = vpack.c.bf16 %v1092_v38, %v1091_v42  ;;  %v1063_v49 = vadd.f32 %v4332_v39, %v3798_v17  ;;  %v5405_v37 = vld [vmem:[#allocation6 + $0x3] ss:$0 sm:$0xff] }
 0x2e2   : > { %v1054_v43 = vpop.f32.mrf.mxu1 }
 0x2e3   : > { %v1103_v44 = vpack.c.bf16 %v1090_v41, %v1089_v40  ;;  %v1055_v47 = vadd.f32 %v3798_v17, %v1054_v43  ;;  %v1095_v57 = vmax.f32 %v1063_v49, 0.0  ;;  %4405 = vmatpush3.bf16.msra.mxu0 %v4899_v13  ;;  %v4915_v13 = vld [vmem:[#allocation4 + $0x198] sm:$0xff]  }
 0x2e4   : > { %v4333_v46 = vpop.f32.mrf.mxu1  ;;  %4406 = vmatprep.subr.bf16.mxu0 %v4900_v15 }
 0x2e5   : > { %v1066_v48 = vadd.f32 %v4333_v46, %v3798_v17  ;;  %4358 = vmatprep.mubr.bf16.mxu0 %v1103_v44  ;;  %v1093_v55 = vmax.f32 %v1055_v47, 0.0 }
 0x2e6   : > { %v1057_v50 = vpop.f32.mrf.mxu1  ;;  %4359 = vmatmul.mubr.bf16.gmra.mxu0 %v1104_v45 }
 0x2e7   : > { %v1058_v51 = vadd.f32 %v3798_v17, %v1057_v50  ;;  %v1096_v52 = vmax.f32 %v1066_v48, 0.0  ;;  %4407 = vmatpush3.bf16.msra.mxu0 %v4900_v15 }
 0x2e8   : > { %v4336_v54 = vpop.f32.mrf.mxu1  ;;  %4408 = vmatprep.subr.bf16.mxu0 %v4901_v16 }
 0x2e9   : > { %v1094_v56 = vmax.f32 %v1058_v51, 0.0  ;;  %v1106_v60 = vpack.c.bf16 %v1096_v52, %v1095_v57  ;;  %v1079_v0 = vadd.f32 %v4336_v54, %v3798_v17  ;;  %v4909_v54 = vld [vmem:[#allocation4 + $0x1b0] sm:$0xff]  }
 0x2ea   : > { %v1070_v58 = vpop.f32.mrf.mxu1 }
 0x2eb   : > { %v1105_v59 = vpack.c.bf16 %v1094_v56, %v1093_v55  ;;  %v1071_v62 = vadd.f32 %v3798_v17, %v1070_v58  ;;  %v1099_v6 = vmax.f32 %v1079_v0, 0.0  ;;  %4409 = vmatpush3.bf16.msra.mxu0 %v4901_v16 }
 0x2ec   : > { %v4337_v61 = vpop.f32.mrf.mxu1 }
 0x2ed   : > { %v1082_v63 = vadd.f32 %v4337_v61, %v3798_v17  ;;  %4362 = vmatprep.mubr.bf16.mxu0 %v1105_v59  ;;  %v1097_v4 = vmax.f32 %v1071_v62, 0.0  ;;  %v4911_v62 = vld [vmem:[#allocation4 + $0x1a8] sm:$0xff]  }
 0x2ee   : > { %v1073_v1 = vpop.f32.mrf.mxu1  ;;  %4363 = vmatmul.mubr.bf16.gmra.mxu0 %v1106_v60 }
 0x2ef   : > { %v1074_v2 = vadd.f32 %v3798_v17, %v1073_v1  ;;  %v1100_v3 = vmax.f32 %v1082_v63, 0.0  ;;  %v4902_v17 = vld [vmem:[#allocation4 + $0x1d8] sm:$0xff]  }
 0x2f0   : > { %4410 = vmatprep.subr.bf16.mxu0 %v4902_v17 }
 0x2f1   : > { %v1098_v5 = vmax.f32 %v1074_v2, 0.0  ;;  %v1108_v8 = vpack.c.bf16 %v1100_v3, %v1099_v6  ;;  %4411 = vmatpush3.bf16.msra.mxu0 %v4902_v17  ;;  %v4913_v6 = vld [vmem:[#allocation4 + $0x1a0] sm:$0xff]  }
 0x2f2   : > { %4412 = vmatprep.subr.bf16.mxu0 %v4903_v18 }
 0x2f3   : > { %v1107_v7 = vpack.c.bf16 %v1098_v5, %v1097_v4 }
 0x2f5   : > { %4366 = vmatprep.mubr.bf16.mxu0 %v1107_v7  ;;  %4413 = vmatpush3.bf16.msra.mxu0 %v4903_v18 }
 0x2f6   : > { %4367 = vmatmul.mubr.bf16.gmra.mxu0 %v1108_v8  ;;  %4414 = vmatprep.subr.bf16.mxu0 %v4904_v19 }
 0x2f7   : > { %4418 = vmatprep.mubr.bf16.mxu0 %v5050_v9 }
 0x2f9   : > { %4415 = vmatpush3.bf16.msra.mxu0 %v4904_v19 }
 0x2fa   : > { %4416 = vmatprep.subr.bf16.mxu0 %v4905_v20 }
 0x2fd   : > { %4417 = vmatpush3.bf16.msra.mxu0 %v4905_v20 }
 0x2fe   : > { %4466 = vmatprep.subr.bf16.mxu0 %v4906_v21 }
 0x300   : > { %4419 = vmatmul.mubr.bf16.vlgmr.msra.gmra.mxu0 %v5051_v23 }
 0x301   : > { %4467 = vmatpush3.bf16.msra.mxu0 %v4906_v21  ;;  %4422 = vmatprep.mubr.bf16.mxu0 %v5052_v24 }
 0x302   : > { %4468 = vmatprep.subr.bf16.mxu0 %v4908_v22 }
 0x305   : > { %4469 = vmatpush3.bf16.msra.mxu0 %v4908_v22 }
 0x306   : > { %4470 = vmatprep.subr.bf16.mxu0 %v4910_v25 }
 0x308   : > { %4423 = vmatmul.mubr.bf16.gmra.mxu0 %v5053_v27 }
 0x309   : > { %4471 = vmatpush3.bf16.msra.mxu0 %v4910_v25  ;;  %4426 = vmatprep.mubr.bf16.mxu0 %v5054_v28 }
 0x30a   : > { %4472 = vmatprep.subr.bf16.mxu0 %v4912_v26 }
 0x30d   : > { %4473 = vmatpush3.bf16.msra.mxu0 %v4912_v26 }
 0x30e   : > { %4474 = vmatprep.subr.bf16.mxu0 %v4914_v29 }
 0x310   : > { %4427 = vmatmul.mubr.bf16.gmra.mxu0 %v5055_v31 }
 0x311   : > { %4475 = vmatpush3.bf16.msra.mxu0 %v4914_v29  ;;  %4430 = vmatprep.mubr.bf16.mxu0 %v5056_v32  ;;  %v4917_v32 = vld [vmem:[#allocation4 + $0x190] sm:$0xff]  }
 0x312   : > { %4476 = vmatprep.subr.bf16.mxu0 %v4916_v30 }
 0x315   : > { %4477 = vmatpush3.bf16.msra.mxu0 %v4916_v30 }
 0x318   : > { %4431 = vmatmul.mubr.bf16.gmra.mxu0 %v5057_v33  ;;  %v4918_v33 = vld [vmem:[#allocation4 + $0x208] sm:$0xff]  }
 0x319   : > { %4482 = vmatprep.mubr.bf16.mxu0 %v5058_v34  ;;  %4478 = vmatprep.subr.bf16.mxu0 %v4918_v33  ;;  %v4919_v34 = vld [vmem:[#allocation4 + $0x188] sm:$0xff]  }
 0x31a   : > { %4479 = vmatpush3.bf16.msra.mxu0 %v4918_v33 }
 0x39e   : > { %v4356_v35 = vpop.f32.mrf.mxu0 }
 0x39f   : > { %v1225_v41 = vadd.f32 %v4356_v35, %v5405_v37  ;;  %v4920_v35 = vld [vmem:[#allocation4 + $0x200] sm:$0xff]  }
 0x3a0   : > { %v1216_v36 = vpop.f32.mrf.mxu0  ;;  %4480 = vmatprep.subr.bf16.mxu0 %v4920_v35 }
 0x3a1   : > { %v1217_v39 = vadd.f32 %v5405_v37, %v1216_v36  ;;  %v1281_v48 = vmax.f32 %v1225_v41, 0.0  ;;  %4481 = vmatpush3.bf16.msra.mxu0 %v4920_v35  ;;  %v4921_v36 = vld [vmem:[#allocation4 + $0x180] sm:$0xff]   ;;  %v5063_v41 = vld [vmem:[%s5349_s5 + $0x68] sm:$0xff]  }
 0x3a2   : > { %v4357_v38 = vpop.f32.mrf.mxu0 }
 0x3a3   : > { %v1228_v40 = vadd.f32 %v4357_v38, %v5405_v37  ;;  %v1279_v46 = vmax.f32 %v1217_v39, 0.0  ;;  %v5060_v38 = vld [vmem:[%s5349_s5 + $0x50] sm:$0xff]   ;;  %v5061_v39 = vld [vmem:[%s5349_s5 + $0x58] sm:$0xff]  }
 0x3a4   : > { %v1219_v42 = vpop.f32.mrf.mxu0 }
 0x3a5   : > { %v1220_v43 = vadd.f32 %v5405_v37, %v1219_v42  ;;  %v1282_v44 = vmax.f32 %v1228_v40, 0.0  ;;  %v5062_v40 = vld [vmem:[%s5349_s5 + $0x60] sm:$0xff]   ;;  %v5064_v42 = vld [vmem:[%s5349_s5 + $0x70] sm:$0xff]  }
 0x3a6   : > { %v4360_v45 = vpop.f32.mrf.mxu0 }
 0x3a7   : > { %v1280_v47 = vmax.f32 %v1220_v43, 0.0  ;;  %v1296_v51 = vpack.c.bf16 %v1282_v44, %v1281_v48  ;;  %v1241_v57 = vadd.f32 %v4360_v45, %v5405_v37  ;;  %v5065_v43 = vld [vmem:[%s5349_s5 + $0x78] sm:$0xff]  }
 0x3a8   : > { %v1232_v49 = vpop.f32.mrf.mxu0  ;;  %v4922_v44 = vld [vmem:[#allocation4 + $0x278] sm:$0xff]  }
 0x3a9   : > { %v1295_v50 = vpack.c.bf16 %v1280_v47, %v1279_v46  ;;  %v1233_v55 = vadd.f32 %v5405_v37, %v1232_v49  ;;  %v1285_v1 = vmax.f32 %v1241_v57, 0.0  ;;  %v5431_v47 = vld [vmem:[#allocation6 + $0x4] ss:$0 sm:$0xff] }
 0x3aa   : > { %v4361_v52 = vpop.f32.mrf.mxu0 }
 0x3ab   : > { %v1244_v56 = vadd.f32 %v4361_v52, %v5405_v37  ;;  %4386 = vmatprep.mubr.bf16.mxu1 %v1295_v50  ;;  %v1283_v63 = vmax.f32 %v1233_v55, 0.0 }
 0x3ac   : > { %v1235_v58 = vpop.f32.mrf.mxu0  ;;  %4387 = vmatmul.mubr.bf16.vlgmr.msra.gmra.mxu1 %v1296_v51 }
 0x3ad   : > { %v1236_v59 = vadd.f32 %v5405_v37, %v1235_v58  ;;  %4435 = vmatpush3.bf16.msra.mxu1 %v5394_v14  ;;  %v1286_v60 = vmax.f32 %v1244_v56, 0.0 }
 0x3ae   : > { %v4364_v61 = vpop.f32.mrf.mxu0  ;;  %4436 = vmatprep.subr.bf16.mxu1 %v4909_v54 }
 0x3af   : > { %v1284_v0 = vmax.f32 %v1236_v59, 0.0  ;;  %v1298_v4 = vpack.c.bf16 %v1286_v60, %v1285_v1  ;;  %v1257_v9 = vadd.f32 %v4364_v61, %v5405_v37 }
 0x3b0   : > { %v1248_v2 = vpop.f32.mrf.mxu0 }
 0x3b1   : > { %v1297_v3 = vpack.c.bf16 %v1284_v0, %v1283_v63  ;;  %4437 = vmatpush3.bf16.msra.mxu1 %v4909_v54  ;;  %v1249_v7 = vadd.f32 %v5405_v37, %v1248_v2  ;;  %v1289_v16 = vmax.f32 %v1257_v9, 0.0  ;;  %v4923_v0 = vld [vmem:[#allocation4 + $0x270] sm:$0xff]  }
 0x3b2   : > { %v4365_v5 = vpop.f32.mrf.mxu0  ;;  %4438 = vmatprep.subr.bf16.mxu1 %v4911_v62 }
 0x3b3   : > { %v1260_v8 = vadd.f32 %v4365_v5, %v5405_v37  ;;  %4390 = vmatprep.mubr.bf16.mxu1 %v1297_v3  ;;  %v1287_v14 = vmax.f32 %v1249_v7, 0.0 }
 0x3b4   : > { %v1251_v10 = vpop.f32.mrf.mxu0  ;;  %4391 = vmatmul.mubr.bf16.gmra.mxu1 %v1298_v4 }
 0x3b5   : > { %v1252_v11 = vadd.f32 %v5405_v37, %v1251_v10  ;;  %4439 = vmatpush3.bf16.msra.mxu1 %v4911_v62  ;;  %v1290_v53 = vmax.f32 %v1260_v8, 0.0  ;;  %v4924_v8 = vld [vmem:[#allocation4 + $0x268] sm:$0xff]  }
 0x3b6   : > { %v4368_v12 = vpop.f32.mrf.mxu0  ;;  %4440 = vmatprep.subr.bf16.mxu1 %v4913_v6 }
 0x3b7   : > { %v1288_v15 = vmax.f32 %v1252_v11, 0.0  ;;  %v1300_v19 = vpack.c.bf16 %v1290_v53, %v1289_v16  ;;  %v1273_v23 = vadd.f32 %v4368_v12, %v5405_v37 }
 0x3b8   : > { %v1264_v17 = vpop.f32.mrf.mxu0 }
 0x3b9   : > { %v1299_v18 = vpack.c.bf16 %v1288_v15, %v1287_v14  ;;  %4441 = vmatpush3.bf16.msra.mxu1 %v4913_v6  ;;  %v1265_v21 = vadd.f32 %v5405_v37, %v1264_v17  ;;  %v1293_v29 = vmax.f32 %v1273_v23, 0.0  ;;  %v4925_v15 = vld [vmem:[#allocation4 + $0x260] sm:$0xff]  }
 0x3ba   : > { %v4369_v20 = vpop.f32.mrf.mxu0  ;;  %4442 = vmatprep.subr.bf16.mxu1 %v4915_v13 }
 0x3bb   : > { %v1276_v22 = vadd.f32 %v4369_v20, %v5405_v37  ;;  %4394 = vmatprep.mubr.bf16.mxu1 %v1299_v18  ;;  %v1291_v27 = vmax.f32 %v1265_v21, 0.0 }
 0x3bc   : > { %v1267_v24 = vpop.f32.mrf.mxu0  ;;  %4395 = vmatmul.mubr.bf16.gmra.mxu1 %v1300_v19 }
 0x3bd   : > { %v1268_v25 = vadd.f32 %v5405_v37, %v1267_v24  ;;  %4443 = vmatpush3.bf16.msra.mxu1 %v4915_v13  ;;  %v1294_v26 = vmax.f32 %v1276_v22, 0.0  ;;  %v5059_v37 = vld [vmem:[%s5349_s5 + $0x48] sm:$0xff]  }
 0x3be   : > { %4444 = vmatprep.subr.bf16.mxu1 %v4917_v32  ;;  %4483 = vmatmul.mubr.bf16.vlgmr.msra.gmra.mxu0 %v5059_v37 }
 0x3bf   : > { %v1292_v28 = vmax.f32 %v1268_v25, 0.0  ;;  %v1302_v31 = vpack.c.bf16 %v1294_v26, %v1293_v29  ;;  %4486 = vmatprep.mubr.bf16.mxu0 %v5060_v38 }
 0x3c1   : > { %v1301_v30 = vpack.c.bf16 %v1292_v28, %v1291_v27  ;;  %4445 = vmatpush3.bf16.msra.mxu1 %v4917_v32 }
 0x3c2   : > { %4446 = vmatprep.subr.bf16.mxu1 %v4919_v34 }
 0x3c3   : > { %4398 = vmatprep.mubr.bf16.mxu1 %v1301_v30 }
 0x3c4   : > { %4399 = vmatmul.mubr.bf16.gmra.mxu1 %v1302_v31 }
 0x3c5   : > { %4447 = vmatpush3.bf16.msra.mxu1 %v4919_v34 }
 0x3c6   : > { %4448 = vmatprep.subr.bf16.mxu1 %v4921_v36  ;;  %4487 = vmatmul.mubr.bf16.gmra.mxu0 %v5061_v39 }
 0x3c7   : > { %4490 = vmatprep.mubr.bf16.mxu0 %v5062_v40 }
 0x3c9   : > { %4449 = vmatpush3.bf16.msra.mxu1 %v4921_v36 }
 0x3ca   : > { %4498 = vmatprep.subr.bf16.mxu1 %v4922_v44 }
 0x3ce   : > { %4491 = vmatmul.mubr.bf16.gmra.mxu0 %v5063_v41  ;;  %v4926_v41 = vld [vmem:[#allocation4 + $0x258] sm:$0xff]  }
 0x3cf   : > { %4494 = vmatprep.mubr.bf16.mxu0 %v5064_v42  ;;  %v4927_v42 = vld [vmem:[#allocation4 + $0x250] sm:$0xff]  }
 0x3d6   : > { %4495 = vmatmul.mubr.bf16.gmra.mxu0 %v5065_v43  ;;  %v4928_v43 = vld [vmem:[#allocation4 + $0x248] sm:$0xff]  }
 0x46c   : > { %v4388_v45 = vpop.f32.mrf.mxu1 }
 0x46d   : > { %v1419_v51 = vadd.f32 %v4388_v45, %v5431_v47  ;;  %v4420_v45 = vpop.f32.mrf.mxu0 }
 0x46e   : > { %v1410_v46 = vpop.f32.mrf.mxu1 }
 0x46f   : > { %v1411_v49 = vadd.f32 %v5431_v47, %v1410_v46  ;;  %v1475_v59 = vmax.f32 %v1419_v51, 0.0  ;;  %v1613_v46 = vpop.f32.mrf.mxu0 }
 0x470   : > { %v4389_v48 = vpop.f32.mrf.mxu1 }
 0x471   : > { %v1422_v50 = vadd.f32 %v4389_v48, %v5431_v47  ;;  %v1473_v57 = vmax.f32 %v1411_v49, 0.0  ;;  %v4931_v48 = vld [vmem:[#allocation4 + $0x2b0] sm:$0xff]   ;;  %v4421_v49 = vpop.f32.mrf.mxu0 }
 0x472   : > { %v1413_v52 = vpop.f32.mrf.mxu1 }
 0x473   : > { %v1414_v54 = vadd.f32 %v5431_v47, %v1413_v52  ;;  %v1476_v55 = vmax.f32 %v1422_v50, 0.0  ;;  %v4932_v50 = vld [vmem:[#allocation4 + $0x2a8] sm:$0xff]   ;;  %v1616_v51 = vpop.f32.mrf.mxu0  ;;  %v4933_v52 = vld [vmem:[#allocation4 + $0x2a0] sm:$0xff]  }
 0x474   : > { %v4392_v56 = vpop.f32.mrf.mxu1 }
 0x475   : > { %v1474_v58 = vmax.f32 %v1414_v54, 0.0  ;;  %v1490_v62 = vpack.c.bf16 %v1476_v55, %v1475_v59  ;;  %v1435_v3 = vadd.f32 %v4392_v56, %v5431_v47  ;;  %v4424_v54 = vpop.f32.mrf.mxu0  ;;  %v4934_v55 = vld [vmem:[#allocation4 + $0x298] sm:$0xff]  }
 0x476   : > { %v1426_v60 = vpop.f32.mrf.mxu1 }
 0x477   : > { %v1489_v61 = vpack.c.bf16 %v1474_v58, %v1473_v57  ;;  %v1427_v1 = vadd.f32 %v5431_v47, %v1426_v60  ;;  %v1479_v11 = vmax.f32 %v1435_v3, 0.0  ;;  %v1629_v56 = vpop.f32.mrf.mxu0 }
 0x478   : > { %v4393_v63 = vpop.f32.mrf.mxu1 }
 0x479   : > { %v1438_v2 = vadd.f32 %v4393_v63, %v5431_v47  ;;  %4450 = vmatprep.mubr.bf16.mxu1 %v1489_v61  ;;  %v1477_v9 = vmax.f32 %v1427_v1, 0.0  ;;  %v4425_v57 = vpop.f32.mrf.mxu0 }
 0x47a   : > { %v1429_v4 = vpop.f32.mrf.mxu1  ;;  %4451 = vmatmul.mubr.bf16.vlgmr.msra.gmra.mxu1 %v1490_v62 }
 0x47b   : > { %v1430_v5 = vadd.f32 %v5431_v47, %v1429_v4  ;;  %4499 = vmatpush3.bf16.msra.mxu1 %v4922_v44  ;;  %v1480_v6 = vmax.f32 %v1438_v2, 0.0  ;;  %v4929_v44 = vld [vmem:[#allocation4 + $0x240] sm:$0xff]   ;;  %v1632_v58 = vpop.f32.mrf.mxu0 }
 0x47c   : > { %v4396_v7 = vpop.f32.mrf.mxu1  ;;  %4500 = vmatprep.subr.bf16.mxu1 %v4923_v0 }
 0x47d   : > { %v1478_v10 = vmax.f32 %v1430_v5, 0.0  ;;  %v1492_v13 = vpack.c.bf16 %v1480_v6, %v1479_v11  ;;  %v1451_v18 = vadd.f32 %v4396_v7, %v5431_v47  ;;  %v5449_v59 = vpop.f32.mrf.mxu0 }
 0x47e   : > { %v1442_v53 = vpop.f32.mrf.mxu1 }
 0x47f   : > { %v1491_v12 = vpack.c.bf16 %v1478_v10, %v1477_v9  ;;  %4501 = vmatpush3.bf16.msra.mxu1 %v4923_v0  ;;  %v1443_v16 = vadd.f32 %v5431_v47, %v1442_v53  ;;  %v1483_v25 = vmax.f32 %v1451_v18, 0.0  ;;  %v5451_v60 = vpop.f32.mrf.mxu0 }
 0x480   : > { %v4397_v14 = vpop.f32.mrf.mxu1  ;;  %4502 = vmatprep.subr.bf16.mxu1 %v4924_v8 }
 0x481   : > { %v1454_v17 = vadd.f32 %v4397_v14, %v5431_v47  ;;  %4454 = vmatprep.mubr.bf16.mxu1 %v1491_v12  ;;  %v1481_v23 = vmax.f32 %v1443_v16, 0.0  ;;  %v5453_v61 = vpop.f32.mrf.mxu0 }
 0x482   : > { %v1445_v19 = vpop.f32.mrf.mxu1  ;;  %4455 = vmatmul.mubr.bf16.gmra.mxu1 %v1492_v13 }
 0x483   : > { %v1446_v20 = vadd.f32 %v5431_v47, %v1445_v19  ;;  %4503 = vmatpush3.bf16.msra.mxu1 %v4924_v8  ;;  %v1484_v21 = vmax.f32 %v1454_v17, 0.0  ;;  %v5455_v62 = vpop.f32.mrf.mxu0 }
 0x484   : > { %v4400_v22 = vpop.f32.mrf.mxu1  ;;  %4504 = vmatprep.subr.bf16.mxu1 %v4925_v15 }
 0x485   : > { %v1482_v24 = vmax.f32 %v1446_v20, 0.0  ;;  %v1494_v28 = vpack.c.bf16 %v1484_v21, %v1483_v25  ;;  %v1467_v32 = vadd.f32 %v4400_v22, %v5431_v47  ;;  %v5457_v63 = vpop.f32.mrf.mxu0  ;;  %v5465_v20 = vld [vmem:[#allocation6 + $0x5] ss:$0 sm:$0xff] }
 0x486   : > { %v1458_v26 = vpop.f32.mrf.mxu1 }
 0x487   : > { %v1493_v27 = vpack.c.bf16 %v1482_v24, %v1481_v23  ;;  %4505 = vmatpush3.bf16.msra.mxu1 %v4925_v15  ;;  %v1459_v30 = vadd.f32 %v5431_v47, %v1458_v26  ;;  %v1487_v38 = vmax.f32 %v1467_v32, 0.0  ;;  %v5459_v0 = vpop.f32.mrf.mxu0 }
 0x488   : > { %v4401_v29 = vpop.f32.mrf.mxu1  ;;  %4506 = vmatprep.subr.bf16.mxu1 %v4926_v41 }
 0x489   : > { %v1470_v31 = vadd.f32 %v4401_v29, %v5431_v47  ;;  %4458 = vmatprep.mubr.bf16.mxu1 %v1493_v27  ;;  %v1485_v36 = vmax.f32 %v1459_v30, 0.0  ;;  %v5461_v1 = vpop.f32.mrf.mxu0 }
 0x48a   : > { %v1461_v33 = vpop.f32.mrf.mxu1  ;;  %4459 = vmatmul.mubr.bf16.gmra.mxu1 %v1494_v28 }
 0x48b   : > { %v1462_v34 = vadd.f32 %v5431_v47, %v1461_v33  ;;  %v1488_v35 = vmax.f32 %v1470_v31, 0.0  ;;  %4507 = vmatpush3.bf16.msra.mxu1 %v4926_v41  ;;  %v4930_v47 = vld [vmem:[#allocation4 + $0x2b8] sm:$0xff]   ;;  %v5463_v2 = vpop.f32.mrf.mxu0 }
 0x48c   : > { %4508 = vmatprep.subr.bf16.mxu1 %v4927_v42  ;;  %4530 = vmatprep.subr.bf16.mxu0 %v4930_v47 }
 0x48d   : > { %v1486_v37 = vmax.f32 %v1462_v34, 0.0  ;;  %v1496_v40 = vpack.c.bf16 %v1488_v35, %v1487_v38  ;;  %4531 = vmatpush3.bf16.msra.mxu0 %v4930_v47  ;;  %v4484_v3 = vpop.f32.mrf.mxu0 }
 0x48e   : > { %4532 = vmatprep.subr.bf16.mxu0 %v4931_v48 }
 0x48f   : > { %v1495_v39 = vpack.c.bf16 %v1486_v37, %v1485_v36  ;;  %4509 = vmatpush3.bf16.msra.mxu1 %v4927_v42  ;;  %v1920_v4 = vpop.f32.mrf.mxu0 }
 0x490   : > { %4510 = vmatprep.subr.bf16.mxu1 %v4928_v43 }
 0x491   : > { %4462 = vmatprep.mubr.bf16.mxu1 %v1495_v39  ;;  %4533 = vmatpush3.bf16.msra.mxu0 %v4931_v48  ;;  %v4485_v5 = vpop.f32.mrf.mxu0 }
 0x492   : > { %4463 = vmatmul.mubr.bf16.gmra.mxu1 %v1496_v40  ;;  %4534 = vmatprep.subr.bf16.mxu0 %v4932_v50 }
 0x493   : > { %4511 = vmatpush3.bf16.msra.mxu1 %v4928_v43  ;;  %v1923_v6 = vpop.f32.mrf.mxu0 }
 0x494   : > { %4512 = vmatprep.subr.bf16.mxu1 %v4929_v44 }
 0x495   : > { %4535 = vmatpush3.bf16.msra.mxu0 %v4932_v50  ;;  %v4488_v7 = vpop.f32.mrf.mxu0 }
 0x496   : > { %4536 = vmatprep.subr.bf16.mxu0 %v4933_v52 }
 0x497   : > { %4513 = vmatpush3.bf16.msra.mxu1 %v4929_v44  ;;  %v1936_v8 = vpop.f32.mrf.mxu0 }
 0x499   : > { %4537 = vmatpush3.bf16.msra.mxu0 %v4933_v52  ;;  %v4489_v9 = vpop.f32.mrf.mxu0 }
 0x49a   : > { %4538 = vmatprep.subr.bf16.mxu0 %v4934_v55 }
 0x49b   : > { %v1939_v11 = vpop.f32.mrf.mxu0 }
 0x49d   : > { %4539 = vmatpush3.bf16.msra.mxu0 %v4934_v55  ;;  %v4492_v15 = vpop.f32.mrf.mxu0 }
 0x49f   : > { %v1952_v24 = vpop.f32.mrf.mxu0 }
 0x4a1   : > { %v4493_v35 = vpop.f32.mrf.mxu0 }
 0x4a3   : > { %v1955_v48 = vpop.f32.mrf.mxu0 }
 0x53a   : > { %v4452_v10 = vpop.f32.mrf.mxu1 }
 0x53b   : > { %v1767_v53 = vadd.f32 %v4452_v10, %v4420_v45 }
 0x53c   : > { %v1758_v12 = vpop.f32.mrf.mxu1 }
 0x53d   : > { %v1759_v13 = vadd.f32 %v1758_v12, %v1613_v46  ;;  %v1985_v18 = vadd.f32 %v4484_v3, %v1767_v53  ;;  %v4496_v3 = vpop.f32.mrf.mxu0 }
 0x53e   : > { %v4453_v14 = vpop.f32.mrf.mxu1 }
 0x53f   : > { %v1983_v16 = vadd.f32 %v1920_v4, %v1759_v13  ;;  %v1770_v17 = vadd.f32 %v4453_v14, %v4421_v49  ;;  %v2009_v28 = vadd.f32 %v5465_v20, %v1985_v18  ;;  %v1968_v13 = vpop.f32.mrf.mxu0 }
 0x540   : > { %v1761_v19 = vpop.f32.mrf.mxu1 }
 0x541   : > { %v1986_v21 = vadd.f32 %v4485_v5, %v1770_v17  ;;  %v1762_v22 = vadd.f32 %v1761_v19, %v1616_v51  ;;  %v2007_v25 = vadd.f32 %v5465_v20, %v1983_v16  ;;  %v2025_v38 = vmax.f32 %v2009_v28, 0.0 }
 0x542   : > { %v4456_v23 = vpop.f32.mrf.mxu1 }
 0x543   : > { %v2010_v26 = vadd.f32 %v5465_v20, %v1986_v21  ;;  %v1984_v27 = vadd.f32 %v1923_v6, %v1762_v22  ;;  %v1783_v31 = vadd.f32 %v4456_v23, %v4424_v54  ;;  %v2023_v36 = vmax.f32 %v2007_v25, 0.0 }
 0x544   : > { %v1774_v29 = vpop.f32.mrf.mxu1 }
 0x545   : > { %v2008_v30 = vadd.f32 %v5465_v20, %v1984_v27  ;;  %v1775_v32 = vadd.f32 %v1774_v29, %v1629_v56  ;;  %v2026_v33 = vmax.f32 %v2010_v26, 0.0  ;;  %v1989_v42 = vadd.f32 %v4488_v7, %v1783_v31 }
 0x546   : > { %v4457_v34 = vpop.f32.mrf.mxu1 }
 0x547   : > { %v2024_v37 = vmax.f32 %v2008_v30, 0.0  ;;  %v1987_v39 = vadd.f32 %v1936_v8, %v1775_v32  ;;  %v1786_v40 = vadd.f32 %v4457_v34, %v4425_v57  ;;  %v2040_v45 = vpack.c.bf16 %v2026_v33, %v2025_v38 }
 0x548   : > { %v1777_v41 = vpop.f32.mrf.mxu1  ;;  %v2013_v54 = vadd.f32 %v5465_v20, %v1989_v42 }
 0x549   : > { %v1778_v43 = vadd.f32 %v1777_v41, %v1632_v58  ;;  %v2039_v44 = vpack.c.bf16 %v2024_v37, %v2023_v36  ;;  %v1990_v46 = vadd.f32 %v4489_v9, %v1786_v40  ;;  %v2011_v50 = vadd.f32 %v5465_v20, %v1987_v39 }
 0x54a   : > { %v4460_v47 = vpop.f32.mrf.mxu1  ;;  %v2029_v10 = vmax.f32 %v2013_v54, 0.0 }
 0x54b   : > { %v1988_v49 = vadd.f32 %v1939_v11, %v1778_v43  ;;  %4514 = vmatprep.mubr.bf16.mxu1 %v2039_v44  ;;  %v2014_v51 = vadd.f32 %v5465_v20, %v1990_v46  ;;  %v1799_v56 = vadd.f32 %v4460_v47, %v5449_v59  ;;  %v2027_v7 = vmax.f32 %v2011_v50, 0.0  ;;  %v4935_v44 = vld [vmem:[#allocation4 + $0x290] sm:$0xff]   ;;  %v4937_v46 = vld [vmem:[#allocation4 + $0x280] sm:$0xff]   ;;  %v4938_v47 = vld [vmem:[#allocation4 + $0x2f8] sm:$0xff]  }
 0x54c   : > { %v1790_v52 = vpop.f32.mrf.mxu1  ;;  %4515 = vmatmul.mubr.bf16.vlgmr.msra.gmra.mxu1 %v2040_v45  ;;  %4540 = vmatprep.subr.bf16.mxu0 %v4935_v44  ;;  %v4936_v45 = vld [vmem:[#allocation4 + $0x288] sm:$0xff]   ;;  %v4944_v50 = vld [vmem:[#allocation4 + $0x2e0] sm:$0xff]  }
 0x54d   : > { %v2012_v55 = vadd.f32 %v5465_v20, %v1988_v49  ;;  %v1791_v57 = vadd.f32 %v1790_v52, %v5451_v60  ;;  %v2030_v4 = vmax.f32 %v2014_v51, 0.0  ;;  %v1993_v11 = vadd.f32 %v4492_v15, %v1799_v56  ;;  %4541 = vmatpush3.bf16.msra.mxu0 %v4935_v44  ;;  %4562 = vmatprep.subr.bf16.mxu1 %v4938_v47  ;;  %v4942_v49 = vld [vmem:[#allocation4 + $0x2e8] sm:$0xff]   ;;  %v4946_v51 = vld [vmem:[#allocation4 + $0x2d8] sm:$0xff]  }
 0x54e   : > { %v4461_v58 = vpop.f32.mrf.mxu1  ;;  %4542 = vmatprep.subr.bf16.mxu0 %v4936_v45  ;;  %4563 = vmatpush3.bf16.msra.mxu1 %v4938_v47 }
 0x54f   : > { %v2028_v5 = vmax.f32 %v2012_v55, 0.0  ;;  %v1802_v6 = vadd.f32 %v4461_v58, %v5453_v61  ;;  %v1991_v8 = vadd.f32 %v1952_v24, %v1791_v57  ;;  %v2042_v17 = vpack.c.bf16 %v2030_v4, %v2029_v10  ;;  %v5491_v55 = vld [vmem:[#allocation6 + $0x6] ss:$0 sm:$0xff] }
 0x550   : > { %v1793_v9 = vpop.f32.mrf.mxu1  ;;  %v2017_v61 = vadd.f32 %v5465_v20, %v1993_v11 }
 0x551   : > { %v1994_v53 = vadd.f32 %v4493_v35, %v1802_v6  ;;  %v1794_v12 = vadd.f32 %v1793_v9, %v5455_v62  ;;  %v2041_v16 = vpack.c.bf16 %v2028_v5, %v2027_v7  ;;  %v2015_v18 = vadd.f32 %v5465_v20, %v1991_v8  ;;  %v4497_v62 = vpop.f32.mrf.mxu0  ;;  %4543 = vmatpush3.bf16.msra.mxu0 %v4936_v45 }
 0x552   : > { %v4464_v14 = vpop.f32.mrf.mxu1  ;;  %v2033_v30 = vmax.f32 %v2017_v61, 0.0  ;;  %4544 = vmatprep.subr.bf16.mxu0 %v4937_v46 }
 0x553   : > { %v2018_v59 = vadd.f32 %v5465_v20, %v1994_v53  ;;  %v1992_v60 = vadd.f32 %v1955_v48, %v1794_v12  ;;  %4518 = vmatprep.mubr.bf16.mxu1 %v2041_v16  ;;  %v1815_v15 = vadd.f32 %v4464_v14, %v5457_v63  ;;  %v2031_v28 = vmax.f32 %v2015_v18, 0.0  ;;  %v1971_v34 = vpop.f32.mrf.mxu0  ;;  %v4940_v48 = vld [vmem:[#allocation4 + $0x2f0] sm:$0xff]  }
 0x554   : > { %v1806_v19 = vpop.f32.mrf.mxu1  ;;  %4519 = vmatmul.mubr.bf16.gmra.mxu1 %v2042_v17  ;;  %4564 = vmatprep.subr.bf16.mxu1 %v4940_v48 }
 0x555   : > { %v2016_v21 = vadd.f32 %v5465_v20, %v1992_v60  ;;  %v1807_v22 = vadd.f32 %v1806_v19, %v5459_v0  ;;  %v2034_v24 = vmax.f32 %v2018_v59, 0.0  ;;  %v1997_v31 = vadd.f32 %v4496_v3, %v1815_v15  ;;  %4545 = vmatpush3.bf16.msra.mxu0 %v4937_v46  ;;  %4565 = vmatpush3.bf16.msra.mxu1 %v4940_v48  ;;  %v4943_v19 = vld [vmem:[#allocation4 + $0x328] sm:$0xff]  }
 0x556   : > { %v4465_v23 = vpop.f32.mrf.mxu1  ;;  %4566 = vmatprep.subr.bf16.mxu1 %v4942_v49 }
 0x557   : > { %v2032_v25 = vmax.f32 %v2016_v21, 0.0  ;;  %v1995_v26 = vadd.f32 %v1968_v13, %v1807_v22  ;;  %v1818_v27 = vadd.f32 %v4465_v23, %v5461_v1  ;;  %v2044_v37 = vpack.c.bf16 %v2034_v24, %v2033_v30  ;;  %v4941_v13 = vld [vmem:[#allocation4 + $0x330] sm:$0xff]  }
 0x558   : > { %v1809_v29 = vpop.f32.mrf.mxu1  ;;  %v2021_v38 = vadd.f32 %v5465_v20, %v1997_v31 }
 0x559   : > { %v1998_v32 = vadd.f32 %v4497_v62, %v1818_v27  ;;  %v1810_v33 = vadd.f32 %v1809_v29, %v5463_v2  ;;  %v2043_v35 = vpack.c.bf16 %v2032_v25, %v2031_v28  ;;  %v2019_v63 = vadd.f32 %v5465_v20, %v1995_v26  ;;  %4567 = vmatpush3.bf16.msra.mxu1 %v4942_v49  ;;  %v4945_v27 = vld [vmem:[#allocation4 + $0x320] sm:$0xff]   ;;  %v4948_v49 = vld [vmem:[#allocation4 + $0x2d0] sm:$0xff]  }
 0x55a   : > { %v2037_v42 = vmax.f32 %v2021_v38, 0.0  ;;  %4568 = vmatprep.subr.bf16.mxu1 %v4944_v50 }
 0x55b   : > { %v2022_v0 = vadd.f32 %v5465_v20, %v1998_v32  ;;  %v1996_v36 = vadd.f32 %v1971_v34, %v1810_v33  ;;  %4522 = vmatprep.mubr.bf16.mxu1 %v2043_v35  ;;  %v2035_v39 = vmax.f32 %v2019_v63, 0.0  ;;  %v4947_v35 = vld [vmem:[#allocation4 + $0x318] sm:$0xff]  }
 0x55c   : > { %4523 = vmatmul.mubr.bf16.gmra.mxu1 %v2044_v37 }
 0x55d   : > { %v2020_v1 = vadd.f32 %v5465_v20, %v1996_v36  ;;  %v2038_v40 = vmax.f32 %v2022_v0, 0.0  ;;  %v4939_v20 = vld [vmem:[#allocation4 + $0x338] sm:$0xff]   ;;  %4569 = vmatpush3.bf16.msra.mxu1 %v4944_v50  ;;  %v4949_v50 = vld [vmem:[#allocation4 + $0x310] sm:$0xff]  }
 0x55e   : > { %4594 = vmatprep.subr.bf16.mxu0 %v4939_v20  ;;  %4570 = vmatprep.subr.bf16.mxu1 %v4946_v51 }
 0x55f   : > { %v2036_v41 = vmax.f32 %v2020_v1, 0.0  ;;  %v2046_v2 = vpack.c.bf16 %v2038_v40, %v2037_v42 }
 0x561   : > { %v2045_v43 = vpack.c.bf16 %v2036_v41, %v2035_v39  ;;  %4571 = vmatpush3.bf16.msra.mxu1 %v4946_v51  ;;  %v4950_v51 = vld [vmem:[#allocation4 + $0x2c8] sm:$0xff]  }
 0x562   : > { %4572 = vmatprep.subr.bf16.mxu1 %v4948_v49 }
 0x563   : > { %4526 = vmatprep.mubr.bf16.mxu1 %v2045_v43 }
 0x564   : > { %4527 = vmatmul.mubr.bf16.gmra.mxu1 %v2046_v2 }
 0x565   : > { %4573 = vmatpush3.bf16.msra.mxu1 %v4948_v49 }
 0x566   : > { %4574 = vmatprep.subr.bf16.mxu1 %v4950_v51 }
 0x569   : > { %4575 = vmatpush3.bf16.msra.mxu1 %v4950_v51 }
 0x60c   : > { %v4516_v52 = vpop.f32.mrf.mxu1 }
 0x60d   : > { %v2163_v3 = vadd.f32 %v4516_v52, %v5491_v55  ;;  %v4951_v52 = vld [vmem:[#allocation4 + $0x308] sm:$0xff]  }
 0x60e   : > { %v2154_v54 = vpop.f32.mrf.mxu1 }
 0x60f   : > { %v2155_v57 = vadd.f32 %v5491_v55, %v2154_v54  ;;  %v2219_v10 = vmax.f32 %v2163_v3, 0.0  ;;  %v4952_v54 = vld [vmem:[#allocation4 + $0x2c0] sm:$0xff]  }
 0x610   : > { %v4517_v56 = vpop.f32.mrf.mxu1  ;;  %4576 = vmatprep.subr.bf16.mxu1 %v4952_v54 }
 0x611   : > { %v2166_v58 = vadd.f32 %v4517_v56, %v5491_v55  ;;  %v2217_v7 = vmax.f32 %v2155_v57, 0.0  ;;  %4577 = vmatpush3.bf16.msra.mxu1 %v4952_v54  ;;  %v4954_v56 = vld [vmem:[#allocation4 + $0x3b8] sm:$0xff]  }
 0x612   : > { %v2157_v4 = vpop.f32.mrf.mxu1  ;;  %4626 = vmatprep.subr.bf16.mxu1 %v4954_v56  ;;  %v4963_v57 = vld [vmem:[#allocation4 + $0x378] sm:$0xff]  }
 0x613   : > { %v2158_v5 = vadd.f32 %v5491_v55, %v2157_v4  ;;  %v2220_v6 = vmax.f32 %v2166_v58, 0.0  ;;  %v5509_v4 = vld [vmem:[#allocation6 + $0x7] ss:$0 sm:$0xff] }
 0x614   : > { %v4520_v9 = vpop.f32.mrf.mxu1 }
 0x615   : > { %v2218_v8 = vmax.f32 %v2158_v5, 0.0  ;;  %v2234_v12 = vpack.c.bf16 %v2220_v6, %v2219_v10  ;;  %v2179_v60 = vadd.f32 %v4520_v9, %v5491_v55 }
 0x616   : > { %v2170_v53 = vpop.f32.mrf.mxu1 }
 0x617   : > { %v2233_v11 = vpack.c.bf16 %v2218_v8, %v2217_v7  ;;  %v2171_v16 = vadd.f32 %v5491_v55, %v2170_v53  ;;  %v2223_v62 = vmax.f32 %v2179_v60, 0.0 }
 0x618   : > { %v4521_v14 = vpop.f32.mrf.mxu1 }
 0x619   : > { %4546 = vmatprep.mubr.bf16.mxu0 %v2233_v11  ;;  %v2182_v59 = vadd.f32 %v4521_v14, %v5491_v55  ;;  %v2221_v15 = vmax.f32 %v2171_v16, 0.0 }
 0x61a   : > { %4547 = vmatmul.mubr.bf16.vlgmr.msra.gmra.mxu0 %v2234_v12  ;;  %v2173_v17 = vpop.f32.mrf.mxu1 }
 0x61b   : > { %4595 = vmatpush3.bf16.msra.mxu0 %v4939_v20  ;;  %v2174_v18 = vadd.f32 %v5491_v55, %v2173_v17  ;;  %v2224_v61 = vmax.f32 %v2182_v59, 0.0  ;;  %v4955_v17 = vld [vmem:[#allocation4 + $0x3b0] sm:$0xff]  }
 0x61c   : > { %4596 = vmatprep.subr.bf16.mxu0 %v4941_v13  ;;  %v4524_v21 = vpop.f32.mrf.mxu1 }
 0x61d   : > { %v2222_v22 = vmax.f32 %v2174_v18, 0.0  ;;  %v2236_v25 = vpack.c.bf16 %v2224_v61, %v2223_v62  ;;  %v2195_v30 = vadd.f32 %v4524_v21, %v5491_v55  ;;  %v4965_v18 = vld [vmem:[#allocation4 + $0x370] sm:$0xff]  }
 0x61e   : > { %v2186_v23 = vpop.f32.mrf.mxu1 }
 0x61f   : > { %4597 = vmatpush3.bf16.msra.mxu0 %v4941_v13  ;;  %v2235_v24 = vpack.c.bf16 %v2222_v22, %v2221_v15  ;;  %v2187_v28 = vadd.f32 %v5491_v55, %v2186_v23  ;;  %v2227_v36 = vmax.f32 %v2195_v30, 0.0  ;;  %v4956_v23 = vld [vmem:[#allocation4 + $0x3a8] sm:$0xff]  }
 0x620   : > { %4598 = vmatprep.subr.bf16.mxu0 %v4943_v19  ;;  %v4525_v26 = vpop.f32.mrf.mxu1 }
 0x621   : > { %v2198_v29 = vadd.f32 %v4525_v26, %v5491_v55  ;;  %4550 = vmatprep.mubr.bf16.mxu0 %v2235_v24  ;;  %v2225_v63 = vmax.f32 %v2187_v28, 0.0  ;;  %v4967_v24 = vld [vmem:[#allocation4 + $0x368] sm:$0xff]  }
 0x622   : > { %v2189_v31 = vpop.f32.mrf.mxu1  ;;  %4551 = vmatmul.mubr.bf16.gmra.mxu0 %v2236_v25 }
 0x623   : > { %v2190_v32 = vadd.f32 %v5491_v55, %v2189_v31  ;;  %4599 = vmatpush3.bf16.msra.mxu0 %v4943_v19  ;;  %v2228_v33 = vmax.f32 %v2198_v29, 0.0 }
 0x624   : > { %v4528_v34 = vpop.f32.mrf.mxu1  ;;  %4600 = vmatprep.subr.bf16.mxu0 %v4945_v27 }
 0x625   : > { %v2226_v0 = vmax.f32 %v2190_v32, 0.0  ;;  %v2238_v1 = vpack.c.bf16 %v2228_v33, %v2227_v36  ;;  %v2211_v42 = vadd.f32 %v4528_v34, %v5491_v55  ;;  %v4957_v34 = vld [vmem:[#allocation4 + $0x3a0] sm:$0xff]  }
 0x626   : > { %v2202_v37 = vpop.f32.mrf.mxu1 }
 0x627   : > { %v2237_v38 = vpack.c.bf16 %v2226_v0, %v2225_v63  ;;  %4601 = vmatpush3.bf16.msra.mxu0 %v4945_v27  ;;  %v2203_v40 = vadd.f32 %v5491_v55, %v2202_v37  ;;  %v2231_v47 = vmax.f32 %v2211_v42, 0.0 }
 0x628   : > { %v4529_v39 = vpop.f32.mrf.mxu1  ;;  %4602 = vmatprep.subr.bf16.mxu0 %v4947_v35 }
 0x629   : > { %v2214_v41 = vadd.f32 %v4529_v39, %v5491_v55  ;;  %4554 = vmatprep.mubr.bf16.mxu0 %v2237_v38  ;;  %v2229_v45 = vmax.f32 %v2203_v40, 0.0  ;;  %v4958_v40 = vld [vmem:[#allocation4 + $0x398] sm:$0xff]  }
 0x62a   : > { %v2205_v43 = vpop.f32.mrf.mxu1  ;;  %4555 = vmatmul.mubr.bf16.gmra.mxu0 %v2238_v1 }
 0x62b   : > { %v2206_v2 = vadd.f32 %v5491_v55, %v2205_v43  ;;  %4603 = vmatpush3.bf16.msra.mxu0 %v4947_v35  ;;  %v2232_v44 = vmax.f32 %v2214_v41, 0.0  ;;  %v4953_v55 = vld [vmem:[#allocation4 + $0x300] sm:$0xff]   ;;  %v4971_v41 = vld [vmem:[#allocation4 + $0x358] sm:$0xff]  }
 0x62c   : > { %4604 = vmatprep.subr.bf16.mxu0 %v4949_v50  ;;  %v4969_v35 = vld [vmem:[#allocation4 + $0x360] sm:$0xff]  }
 0x62d   : > { %v2230_v46 = vmax.f32 %v2206_v2, 0.0  ;;  %v2240_v48 = vpack.c.bf16 %v2232_v44, %v2231_v47 }
 0x62f   : > { %v2239_v20 = vpack.c.bf16 %v2230_v46, %v2229_v45  ;;  %4605 = vmatpush3.bf16.msra.mxu0 %v4949_v50 }
 0x630   : > { %4606 = vmatprep.subr.bf16.mxu0 %v4951_v52 }
 0x631   : > { %4558 = vmatprep.mubr.bf16.mxu0 %v2239_v20  ;;  %v4959_v20 = vld [vmem:[#allocation4 + $0x390] sm:$0xff]  }
 0x632   : > { %4559 = vmatmul.mubr.bf16.gmra.mxu0 %v2240_v48  ;;  %v4973_v48 = vld [vmem:[#allocation4 + $0x350] sm:$0xff]  }
 0x633   : > { %4607 = vmatpush3.bf16.msra.mxu0 %v4951_v52 }
 0x634   : > { %4608 = vmatprep.subr.bf16.mxu0 %v4953_v55 }
 0x637   : > { %4609 = vmatpush3.bf16.msra.mxu0 %v4953_v55 }
 0x638   : > { %4658 = vmatprep.subr.bf16.mxu0 %v4963_v57 }
 0x6da   : > { %v4548_v58 = vpop.f32.mrf.mxu0 }
 0x6db   : > { %v2357_v8 = vadd.f32 %v4548_v58, %v5509_v4 }
 0x6dc   : > { %v2348_v3 = vpop.f32.mrf.mxu0 }
 0x6dd   : > { %v2349_v6 = vadd.f32 %v5509_v4, %v2348_v3  ;;  %v2413_v14 = vmax.f32 %v2357_v8, 0.0  ;;  %v4962_v8 = vld [vmem:[#allocation4 + $0x3f8] sm:$0xff]  }
 0x6de   : > { %v4549_v5 = vpop.f32.mrf.mxu0 }
 0x6df   : > { %v2360_v7 = vadd.f32 %v4549_v5, %v5509_v4  ;;  %v2411_v53 = vmax.f32 %v2349_v6, 0.0 }
 0x6e0   : > { %v2351_v9 = vpop.f32.mrf.mxu0 }
 0x6e1   : > { %v2352_v10 = vadd.f32 %v5509_v4, %v2351_v9  ;;  %v2414_v11 = vmax.f32 %v2360_v7, 0.0  ;;  %v4961_v7 = vld [vmem:[#allocation4 + $0x380] sm:$0xff]   ;;  %v4964_v9 = vld [vmem:[#allocation4 + $0x3f0] sm:$0xff]  }
 0x6e2   : > { %v4552_v13 = vpop.f32.mrf.mxu0 }
 0x6e3   : > { %v2412_v12 = vmax.f32 %v2352_v10, 0.0  ;;  %v2428_v60 = vpack.c.bf16 %v2414_v11, %v2413_v14  ;;  %v2373_v15 = vadd.f32 %v4552_v13, %v5509_v4  ;;  %v5067_v10 = vld [vmem:[%s5349_s5 + $0x8] sm:$0xff]   ;;  %v5068_v11 = vld [vmem:[%s5349_s5 + $0x10] sm:$0xff]   ;;  %v5069_v13 = vld [vmem:[%s5349_s5 + $0x18] sm:$0xff]  }
 0x6e4   : > { %v2364_v59 = vpop.f32.mrf.mxu0  ;;  %v5070_v14 = vld [vmem:[%s5349_s5 + $0x20] sm:$0xff]  }
 0x6e5   : > { %v2427_v16 = vpack.c.bf16 %v2412_v12, %v2411_v53  ;;  %v2365_v61 = vadd.f32 %v5509_v4, %v2364_v59  ;;  %v2417_v29 = vmax.f32 %v2373_v15, 0.0  ;;  %v4966_v53 = vld [vmem:[#allocation4 + $0x3e8] sm:$0xff]   ;;  %v4968_v12 = vld [vmem:[#allocation4 + $0x3e0] sm:$0xff]   ;;  %v4972_v59 = vld [vmem:[#allocation4 + $0x3d0] sm:$0xff]  }
 0x6e6   : > { %v4553_v19 = vpop.f32.mrf.mxu0  ;;  %v4976_v15 = vld [vmem:[#allocation4 + $0x3c0] sm:$0xff]  }
 0x6e7   : > { %4578 = vmatprep.mubr.bf16.mxu1 %v2427_v16  ;;  %4610 = vmatprep.mubr.bf16.mxu0 %v2427_v16  ;;  %v2376_v21 = vadd.f32 %v4553_v19, %v5509_v4  ;;  %v2415_v27 = vmax.f32 %v2365_v61, 0.0  ;;  %v4970_v16 = vld [vmem:[#allocation4 + $0x3d8] sm:$0xff]   ;;  %v5074_v19 = vld [vmem:[%s5349_s5 + $0x40] sm:$0xff]   ;;  %v4974_v61 = vld [vmem:[#allocation4 + $0x3c8] sm:$0xff]  }
 0x6e8   : > { %4579 = vmatmul.mubr.bf16.vlgmr.msra.gmra.mxu1 %v2428_v60  ;;  %4611 = vmatmul.mubr.bf16.vlgmr.msra.gmra.mxu0 %v2428_v60  ;;  %v2367_v22 = vpop.f32.mrf.mxu0  ;;  %v5071_v60 = vld [vmem:[%s5349_s5 + $0x28] sm:$0xff]  }
 0x6e9   : > { %4627 = vmatpush3.bf16.msra.mxu1 %v4954_v56  ;;  %4659 = vmatpush3.bf16.msra.mxu0 %v4963_v57  ;;  %v2368_v62 = vadd.f32 %v5509_v4, %v2367_v22  ;;  %v2418_v25 = vmax.f32 %v2376_v21, 0.0  ;;  %v4960_v56 = vld [vmem:[#allocation4 + $0x388] sm:$0xff]   ;;  %v4977_v22 = vld [vmem:[#allocation4 + $0x340] sm:$0xff]  }
 0x6ea   : > { %4628 = vmatprep.subr.bf16.mxu1 %v4955_v17  ;;  %4660 = vmatprep.subr.bf16.mxu0 %v4965_v18  ;;  %v4556_v26 = vpop.f32.mrf.mxu0  ;;  %v4975_v21 = vld [vmem:[#allocation4 + $0x348] sm:$0xff]  }
 0x6eb   : > { %v2416_v28 = vmax.f32 %v2368_v62, 0.0  ;;  %v2430_v32 = vpack.c.bf16 %v2418_v25, %v2417_v29  ;;  %v2389_v36 = vadd.f32 %v4556_v26, %v5509_v4  ;;  %v5075_v62 = vld [vmem:[%s5349_s5 + $0x48] sm:$0xff]   ;;  %v5078_v25 = vld [vmem:[%s5349_s5 + $0x60] sm:$0xff]   ;;  %v4978_v29 = vld [vmem:[#allocation4 + $0x438] sm:$0xff]  }
 0x6ec   : > { %v2380_v30 = vpop.f32.mrf.mxu0  ;;  %v5079_v26 = vld [vmem:[%s5349_s5 + $0x68] sm:$0xff]  }
 0x6ed   : > { %4629 = vmatpush3.bf16.msra.mxu1 %v4955_v17  ;;  %4661 = vmatpush3.bf16.msra.mxu0 %v4965_v18  ;;  %v2429_v31 = vpack.c.bf16 %v2416_v28, %v2415_v27  ;;  %v2381_v63 = vadd.f32 %v5509_v4, %v2380_v30  ;;  %v2421_v2 = vmax.f32 %v2389_v36, 0.0  ;;  %v5072_v17 = vld [vmem:[%s5349_s5 + $0x30] sm:$0xff]   ;;  %v5073_v18 = vld [vmem:[%s5349_s5 + $0x38] sm:$0xff]  }
 0x6ee   : > { %4630 = vmatprep.subr.bf16.mxu1 %v4956_v23  ;;  %4662 = vmatprep.subr.bf16.mxu0 %v4967_v24  ;;  %v4557_v33 = vpop.f32.mrf.mxu0  ;;  %v5080_v27 = vld [vmem:[%s5349_s5 + $0x70] sm:$0xff]   ;;  %v5081_v28 = vld [vmem:[%s5349_s5 + $0x78] sm:$0xff]  }
 0x6ef   : > { %v2392_v0 = vadd.f32 %v4557_v33, %v5509_v4  ;;  %4582 = vmatprep.mubr.bf16.mxu1 %v2429_v31  ;;  %4614 = vmatprep.mubr.bf16.mxu0 %v2429_v31  ;;  %v2419_v42 = vmax.f32 %v2381_v63, 0.0  ;;  %v4979_v30 = vld [vmem:[#allocation4 + $0x430] sm:$0xff]   ;;  %v4980_v31 = vld [vmem:[#allocation4 + $0x428] sm:$0xff]  }
 0x6f0   : > { %v2383_v37 = vpop.f32.mrf.mxu0  ;;  %4583 = vmatmul.mubr.bf16.gmra.mxu1 %v2430_v32  ;;  %4615 = vmatmul.mubr.bf16.gmra.mxu0 %v2430_v32  ;;  %v4981_v32 = vld [vmem:[#allocation4 + $0x420] sm:$0xff]   ;;  %v3868_v63 = vld [vmem:[#allocation6 + $0x8] ss:$0 sm:$0xff] }
 0x6f1   : > { %v2384_v38 = vadd.f32 %v5509_v4, %v2383_v37  ;;  %4631 = vmatpush3.bf16.msra.mxu1 %v4956_v23  ;;  %4663 = vmatpush3.bf16.msra.mxu0 %v4967_v24  ;;  %v2422_v1 = vmax.f32 %v2392_v0, 0.0  ;;  %v5076_v23 = vld [vmem:[%s5349_s5 + $0x50] sm:$0xff]   ;;  %v5077_v24 = vld [vmem:[%s5349_s5 + $0x58] sm:$0xff]  }
 0x6f2   : > { %v4560_v39 = vpop.f32.mrf.mxu0  ;;  %4632 = vmatprep.subr.bf16.mxu1 %v4957_v34  ;;  %4664 = vmatprep.subr.bf16.mxu0 %v4969_v35 }
 0x6f3   : > { %v2420_v43 = vmax.f32 %v2384_v38, 0.0  ;;  %v2432_v46 = vpack.c.bf16 %v2422_v1, %v2421_v2  ;;  %v2405_v51 = vadd.f32 %v4560_v39, %v5509_v4 }
 0x6f4   : > { %v2396_v44 = vpop.f32.mrf.mxu0 }
 0x6f5   : > { %v2431_v45 = vpack.c.bf16 %v2420_v43, %v2419_v42  ;;  %4633 = vmatpush3.bf16.msra.mxu1 %v4957_v34  ;;  %4665 = vmatpush3.bf16.msra.mxu0 %v4969_v35  ;;  %v2397_v49 = vadd.f32 %v5509_v4, %v2396_v44  ;;  %v2425_v3 = vmax.f32 %v2405_v51, 0.0 }
 0x6f6   : > { %v4561_v47 = vpop.f32.mrf.mxu0  ;;  %4634 = vmatprep.subr.bf16.mxu1 %v4958_v40  ;;  %4666 = vmatprep.subr.bf16.mxu0 %v4971_v41 }
 0x6f7   : > { %v2408_v50 = vadd.f32 %v4561_v47, %v5509_v4  ;;  %4586 = vmatprep.mubr.bf16.mxu1 %v2431_v45  ;;  %4618 = vmatprep.mubr.bf16.mxu0 %v2431_v45  ;;  %v2423_v57 = vmax.f32 %v2397_v49, 0.0 }
 0x6f8   : > { %v2399_v52 = vpop.f32.mrf.mxu0  ;;  %4587 = vmatmul.mubr.bf16.gmra.mxu1 %v2432_v46  ;;  %4619 = vmatmul.mubr.bf16.gmra.mxu0 %v2432_v46 }
 0x6f9   : > { %v2400_v54 = vadd.f32 %v5509_v4, %v2399_v52  ;;  %4635 = vmatpush3.bf16.msra.mxu1 %v4958_v40  ;;  %4667 = vmatpush3.bf16.msra.mxu0 %v4971_v41  ;;  %v2426_v55 = vmax.f32 %v2408_v50, 0.0  ;;  %v5066_v4 = vld [vmem:[%s5349_s5] sm:$0xff]  }
 0x6fa   : > { %4636 = vmatprep.subr.bf16.mxu1 %v4959_v20  ;;  %4668 = vmatprep.subr.bf16.mxu0 %v4973_v48 }
 0x6fb   : > { %v2424_v58 = vmax.f32 %v2400_v54, 0.0  ;;  %v2434_v6 = vpack.c.bf16 %v2426_v55, %v2425_v3 }
 0x6fd   : > { %v2433_v5 = vpack.c.bf16 %v2424_v58, %v2423_v57  ;;  %4637 = vmatpush3.bf16.msra.mxu1 %v4959_v20  ;;  %4669 = vmatpush3.bf16.msra.mxu0 %v4973_v48 }
 0x6fe   : > { %4638 = vmatprep.subr.bf16.mxu1 %v4960_v56  ;;  %4670 = vmatprep.subr.bf16.mxu0 %v4975_v21 }
 0x6ff   : > { %4590 = vmatprep.mubr.bf16.mxu1 %v2433_v5  ;;  %4622 = vmatprep.mubr.bf16.mxu0 %v2433_v5 }
 0x700   : > { %4591 = vmatmul.mubr.bf16.gmra.mxu1 %v2434_v6  ;;  %4623 = vmatmul.mubr.bf16.gmra.mxu0 %v2434_v6 }
 0x701   : > { %4639 = vmatpush3.bf16.msra.mxu1 %v4960_v56  ;;  %4642 = vmatprep.mubr.bf16.mxu1 %v5066_v4 }
 0x702   : > { %4640 = vmatprep.subr.bf16.mxu1 %v4961_v7  ;;  %4671 = vmatpush3.bf16.msra.mxu0 %v4975_v21 }
 0x703   : > { %4672 = vmatprep.subr.bf16.mxu0 %v4977_v22 }
 0x705   : > { %4641 = vmatpush3.bf16.msra.mxu1 %v4961_v7 }
 0x706   : > { %4690 = vmatprep.subr.bf16.mxu1 %v4962_v8  ;;  %4673 = vmatpush3.bf16.msra.mxu0 %v4977_v22 }
 0x707   : > { %4722 = vmatprep.subr.bf16.mxu0 %v4978_v29 }
 0x708   : > { %4643 = vmatmul.mubr.bf16.vlgmr.msra.gmra.mxu1 %v5067_v10 }
 0x709   : > { %4691 = vmatpush3.bf16.msra.mxu1 %v4962_v8  ;;  %4646 = vmatprep.mubr.bf16.mxu1 %v5068_v11 }
 0x70a   : > { %4692 = vmatprep.subr.bf16.mxu1 %v4964_v9 }
 0x70d   : > { %4693 = vmatpush3.bf16.msra.mxu1 %v4964_v9 }
 0x70e   : > { %4694 = vmatprep.subr.bf16.mxu1 %v4966_v53 }
 0x710   : > { %4647 = vmatmul.mubr.bf16.gmra.mxu1 %v5069_v13  ;;  %v4982_v13 = vld [vmem:[#allocation4 + $0x418] sm:$0xff]  }
 0x711   : > { %4695 = vmatpush3.bf16.msra.mxu1 %v4966_v53  ;;  %4650 = vmatprep.mubr.bf16.mxu1 %v5070_v14  ;;  %v4983_v14 = vld [vmem:[#allocation4 + $0x410] sm:$0xff]  }
 0x712   : > { %4696 = vmatprep.subr.bf16.mxu1 %v4968_v12 }
 0x715   : > { %4697 = vmatpush3.bf16.msra.mxu1 %v4968_v12 }
 0x716   : > { %4698 = vmatprep.subr.bf16.mxu1 %v4970_v16 }
 0x718   : > { %4651 = vmatmul.mubr.bf16.gmra.mxu1 %v5071_v60 }
 0x719   : > { %4699 = vmatpush3.bf16.msra.mxu1 %v4970_v16  ;;  %4654 = vmatprep.mubr.bf16.mxu1 %v5072_v17  ;;  %v4984_v16 = vld [vmem:[#allocation4 + $0x408] sm:$0xff]  }
 0x71a   : > { %4700 = vmatprep.subr.bf16.mxu1 %v4972_v59 }
 0x71d   : > { %4701 = vmatpush3.bf16.msra.mxu1 %v4972_v59  ;;  %v4985_v59 = vld [vmem:[#allocation4 + $0x400] sm:$0xff]  }
 0x71e   : > { %4702 = vmatprep.subr.bf16.mxu1 %v4974_v61 }
 0x720   : > { %4655 = vmatmul.mubr.bf16.gmra.mxu1 %v5073_v18 }
 0x721   : > { %4706 = vmatprep.mubr.bf16.mxu1 %v5074_v19  ;;  %4703 = vmatpush3.bf16.msra.mxu1 %v4974_v61 }
 0x722   : > { %4704 = vmatprep.subr.bf16.mxu1 %v4976_v15 }
 0x725   : > { %4705 = vmatpush3.bf16.msra.mxu1 %v4976_v15 }
 0x726   : > { %4754 = vmatprep.subr.bf16.mxu1 %v4978_v29 }
 0x728   : > { %4707 = vmatmul.mubr.bf16.vlgmr.msra.gmra.mxu1 %v5075_v62 }
 0x729   : > { %4710 = vmatprep.mubr.bf16.mxu1 %v5076_v23  ;;  %4762 = vmatpush3.bf16.msra.mxu1 %v4978_v29 }
 0x72a   : > { %4755 = vmatprep.subr.bf16.mxu1 %v4979_v30 }
 0x72d   : > { %4763 = vmatpush3.bf16.msra.mxu1 %v4979_v30 }
 0x72e   : > { %4756 = vmatprep.subr.bf16.mxu1 %v4980_v31 }
 0x730   : > { %4711 = vmatmul.mubr.bf16.gmra.mxu1 %v5077_v24 }
 0x731   : > { %4714 = vmatprep.mubr.bf16.mxu1 %v5078_v25  ;;  %4764 = vmatpush3.bf16.msra.mxu1 %v4980_v31 }
 0x732   : > { %4757 = vmatprep.subr.bf16.mxu1 %v4981_v32 }
 0x735   : > { %4765 = vmatpush3.bf16.msra.mxu1 %v4981_v32 }
 0x736   : > { %4758 = vmatprep.subr.bf16.mxu1 %v4982_v13 }
 0x738   : > { %4715 = vmatmul.mubr.bf16.gmra.mxu1 %v5079_v26 }
 0x739   : > { %4718 = vmatprep.mubr.bf16.mxu1 %v5080_v27  ;;  %4766 = vmatpush3.bf16.msra.mxu1 %v4982_v13 }
 0x73a   : > { %4759 = vmatprep.subr.bf16.mxu1 %v4983_v14 }
 0x73d   : > { %4767 = vmatpush3.bf16.msra.mxu1 %v4983_v14 }
 0x73e   : > { %4760 = vmatprep.subr.bf16.mxu1 %v4984_v16 }
 0x740   : > { %4719 = vmatmul.mubr.bf16.gmra.mxu1 %v5081_v28 }
 0x741   : > { %4768 = vmatpush3.bf16.msra.mxu1 %v4984_v16 }
 0x742   : > { %4761 = vmatprep.subr.bf16.mxu1 %v4985_v59 }
 0x745   : > { %4769 = vmatpush3.bf16.msra.mxu1 %v4985_v59 }
 0x7a8   : > { %v4580_v33 = vpop.f32.mrf.mxu1  ;;  %v5547_v62 = vpop.f32.mrf.mxu0 }
 0x7a9   : > { %v2551_v1 = vadd.f32 %v4580_v33, %v3868_v63 }
 0x7aa   : > { %v2542_v34 = vpop.f32.mrf.mxu1  ;;  %v5551_v24 = vpop.f32.mrf.mxu0 }
 0x7ab   : > { %v2543_v37 = vadd.f32 %v3868_v63, %v2542_v34 }
 0x7ac   : > { %v4581_v35 = vpop.f32.mrf.mxu1  ;;  %v5555_v26 = vpop.f32.mrf.mxu0 }
 0x7ad   : > { %v2554_v0 = vadd.f32 %v4581_v35, %v3868_v63 }
 0x7ae   : > { %v2545_v36 = vpop.f32.mrf.mxu1  ;;  %v5559_v28 = vpop.f32.mrf.mxu0 }
 0x7af   : > { %v2546_v38 = vadd.f32 %v3868_v63, %v2545_v36  ;;  %v2768_v41 = vpack.c.bf16 %v2554_v0, %v2551_v1 }
 0x7b0   : > { %v4584_v40 = vpop.f32.mrf.mxu1 }
 0x7b1   : > { %v2767_v39 = vpack.c.bf16 %v2546_v38, %v2543_v37  ;;  %v2567_v47 = vadd.f32 %v4584_v40, %v3868_v63 }
 0x7b2   : > { %v2558_v42 = vpop.f32.mrf.mxu1 }
 0x7b3   : > { %4674 = vmatprep.mubr.bf16.mxu0 %v2767_v39  ;;  %v2559_v45 = vadd.f32 %v3868_v63, %v2558_v42 }
 0x7b4   : > { %4675 = vmatmul.mubr.bf16.vlgmr.msra.gmra.mxu0 %v2768_v41  ;;  %v4585_v43 = vpop.f32.mrf.mxu1 }
 0x7b5   : > { %4723 = vmatpush3.bf16.msra.mxu0 %v4978_v29  ;;  %v2570_v2 = vadd.f32 %v4585_v43, %v3868_v63 }
 0x7b6   : > { %4724 = vmatprep.subr.bf16.mxu0 %v4979_v30  ;;  %v2561_v44 = vpop.f32.mrf.mxu1 }
 0x7b7   : > { %v2562_v46 = vadd.f32 %v3868_v63, %v2561_v44  ;;  %v2770_v49 = vpack.c.bf16 %v2570_v2, %v2567_v47 }
 0x7b8   : > { %v4588_v20 = vpop.f32.mrf.mxu1 }
 0x7b9   : > { %4725 = vmatpush3.bf16.msra.mxu0 %v4979_v30  ;;  %v2769_v48 = vpack.c.bf16 %v2562_v46, %v2559_v45  ;;  %v2583_v57 = vadd.f32 %v4588_v20, %v3868_v63  ;;  %v5563_v30 = vpop.f32.mrf.mxu0 }
 0x7ba   : > { %4726 = vmatprep.subr.bf16.mxu0 %v4980_v31  ;;  %v2574_v50 = vpop.f32.mrf.mxu1 }
 0x7bb   : > { %4678 = vmatprep.mubr.bf16.mxu0 %v2769_v48  ;;  %v2575_v55 = vadd.f32 %v3868_v63, %v2574_v50 }
 0x7bc   : > { %v4589_v51 = vpop.f32.mrf.mxu1  ;;  %4679 = vmatmul.mubr.bf16.gmra.mxu0 %v2770_v49 }
 0x7bd   : > { %4727 = vmatpush3.bf16.msra.mxu0 %v4980_v31  ;;  %v2586_v52 = vadd.f32 %v4589_v51, %v3868_v63 }
 0x7be   : > { %v2577_v54 = vpop.f32.mrf.mxu1  ;;  %4728 = vmatprep.subr.bf16.mxu0 %v4981_v32 }
 0x7bf   : > { %v2578_v56 = vadd.f32 %v3868_v63, %v2577_v54  ;;  %v2772_v5 = vpack.c.bf16 %v2586_v52, %v2583_v57 }
 0x7c0   : > { %v4592_v58 = vpop.f32.mrf.mxu1 }
 0x7c1   : > { %v2771_v3 = vpack.c.bf16 %v2578_v56, %v2575_v55  ;;  %4729 = vmatpush3.bf16.msra.mxu0 %v4981_v32  ;;  %v2599_v11 = vadd.f32 %v4592_v58, %v3868_v63  ;;  %v5567_v32 = vpop.f32.mrf.mxu0 }
 0x7c2   : > { %v2590_v6 = vpop.f32.mrf.mxu1  ;;  %4730 = vmatprep.subr.bf16.mxu0 %v4982_v13 }
 0x7c3   : > { %4682 = vmatprep.mubr.bf16.mxu0 %v2771_v3  ;;  %v2591_v9 = vadd.f32 %v3868_v63, %v2590_v6  ;;  %v5571_v34 = vpop.f32.mrf.mxu0 }
 0x7c4   : > { %v4593_v7 = vpop.f32.mrf.mxu1  ;;  %4683 = vmatmul.mubr.bf16.gmra.mxu0 %v2772_v5  ;;  %v5595_v5 = vld [vmem:[#allocation6 + $0x9] ss:$0 sm:$0xff] }
 0x7c5   : > { %v2602_v4 = vadd.f32 %v4593_v7, %v3868_v63  ;;  %4731 = vmatpush3.bf16.msra.mxu0 %v4982_v13 }
 0x7c6   : > { %v2593_v8 = vpop.f32.mrf.mxu1  ;;  %4732 = vmatprep.subr.bf16.mxu0 %v4983_v14 }
 0x7c7   : > { %v2594_v10 = vadd.f32 %v3868_v63, %v2593_v8  ;;  %v2774_v12 = vpack.c.bf16 %v2602_v4, %v2599_v11  ;;  %v5575_v63 = vpop.f32.mrf.mxu0 }
 0x7c8   : > { %v4644_v60 = vpop.f32.mrf.mxu1 }
 0x7c9   : > { %v2773_v53 = vpack.c.bf16 %v2594_v10, %v2591_v9  ;;  %4733 = vmatpush3.bf16.msra.mxu0 %v4983_v14  ;;  %v5579_v36 = vpop.f32.mrf.mxu0 }
 0x7ca   : > { %4734 = vmatprep.subr.bf16.mxu0 %v4984_v16  ;;  %v2891_v17 = vpop.f32.mrf.mxu1 }
 0x7cb   : > { %4686 = vmatprep.mubr.bf16.mxu0 %v2773_v53  ;;  %v5581_v38 = vpop.f32.mrf.mxu0 }
 0x7cc   : > { %4687 = vmatmul.mubr.bf16.gmra.mxu0 %v2774_v12  ;;  %v4645_v18 = vpop.f32.mrf.mxu1 }
 0x7cd   : > { %4735 = vmatpush3.bf16.msra.mxu0 %v4984_v16  ;;  %v5583_v39 = vpop.f32.mrf.mxu0 }
 0x7ce   : > { %4736 = vmatprep.subr.bf16.mxu0 %v4985_v59  ;;  %v2894_v19 = vpop.f32.mrf.mxu1 }
 0x7cf   : > { %v5585_v41 = vpop.f32.mrf.mxu0 }
 0x7d0   : > { %v4648_v61 = vpop.f32.mrf.mxu1 }
 0x7d1   : > { %4737 = vmatpush3.bf16.msra.mxu0 %v4985_v59  ;;  %v5587_v43 = vpop.f32.mrf.mxu0 }
 0x7d2   : > { %v2907_v21 = vpop.f32.mrf.mxu1 }
 0x7d3   : > { %v5589_v44 = vpop.f32.mrf.mxu0 }
 0x7d4   : > { %v5543_v15 = vpop.f32.mrf.mxu1 }
 0x7d5   : > { %v5591_v46 = vpop.f32.mrf.mxu0 }
 0x7d6   : > { %v5545_v22 = vpop.f32.mrf.mxu1 }
 0x7d7   : > { %v5593_v20 = vpop.f32.mrf.mxu0 }
 0x7d8   : > { %v5549_v23 = vpop.f32.mrf.mxu1 }
 0x7da   : > { %v5553_v25 = vpop.f32.mrf.mxu1 }
 0x7dc   : > { %v5557_v27 = vpop.f32.mrf.mxu1 }
 0x7de   : > { %v5561_v29 = vpop.f32.mrf.mxu1 }
 0x7e0   : > { %v5565_v31 = vpop.f32.mrf.mxu1 }
 0x7e2   : > { %v5569_v33 = vpop.f32.mrf.mxu1 }
 0x7e4   : > { %v5573_v35 = vpop.f32.mrf.mxu1 }
 0x7e6   : > { %v5577_v0 = vpop.f32.mrf.mxu1 }
 0x7e8   : > { %v4708_v37 = vpop.f32.mrf.mxu1 }
 0x7ea   : > { %v3198_v1 = vpop.f32.mrf.mxu1 }
 0x7ec   : > { %v4709_v40 = vpop.f32.mrf.mxu1 }
 0x7ee   : > { %v3201_v42 = vpop.f32.mrf.mxu1 }
 0x7f0   : > { %v4712_v2 = vpop.f32.mrf.mxu1 }
 0x7f2   : > { %v3214_v45 = vpop.f32.mrf.mxu1 }
 0x7f4   : > { %v4713_v47 = vpop.f32.mrf.mxu1 }
 0x7f6   : > { %v3217_v49 = vpop.f32.mrf.mxu1 }
 0x7f8   : > { %v4716_v57 = vpop.f32.mrf.mxu1 }
 0x7fa   : > { %v3230_v11 = vpop.f32.mrf.mxu1 }
 0x874   : > { %v4676_v48 = vpop.f32.mrf.mxu0 }
 0x875   : > { %v3045_v50 = vadd.f32 %v4676_v48, %v4644_v60 }
 0x876   : > { %v3036_v51 = vpop.f32.mrf.mxu0 }
 0x877   : > { %v3037_v52 = vadd.f32 %v3036_v51, %v2891_v17  ;;  %v3263_v58 = vadd.f32 %v4708_v37, %v3045_v50  ;;  %v4717_v37 = vpop.f32.mrf.mxu1 }
 0x878   : > { %v4677_v54 = vpop.f32.mrf.mxu0 }
 0x879   : > { %v3261_v55 = vadd.f32 %v3198_v1, %v3037_v52  ;;  %v3048_v56 = vadd.f32 %v4677_v54, %v4645_v18  ;;  %v3287_v53 = vadd.f32 %v5595_v5, %v3263_v58 }
 0x87a   : > { %v3039_v3 = vpop.f32.mrf.mxu0 }
 0x87b   : > { %v3264_v6 = vadd.f32 %v4709_v40, %v3048_v56  ;;  %v3040_v7 = vadd.f32 %v3039_v3, %v2894_v19  ;;  %v3285_v4 = vadd.f32 %v5595_v5, %v3261_v55  ;;  %v3303_v19 = vmax.f32 %v3287_v53, 0.0 }
 0x87c   : > { %v4680_v10 = vpop.f32.mrf.mxu0 }
 0x87d   : > { %v3288_v8 = vadd.f32 %v5595_v5, %v3264_v6  ;;  %v3262_v9 = vadd.f32 %v3201_v42, %v3040_v7  ;;  %v3061_v13 = vadd.f32 %v4680_v10, %v4648_v61  ;;  %v3301_v60 = vmax.f32 %v3285_v4, 0.0  ;;  %v3233_v61 = vpop.f32.mrf.mxu1 }
 0x87e   : > { %v3052_v14 = vpop.f32.mrf.mxu0 }
 0x87f   : > { %v3286_v12 = vadd.f32 %v5595_v5, %v3262_v9  ;;  %v3304_v16 = vmax.f32 %v3288_v8, 0.0  ;;  %v3053_v59 = vadd.f32 %v3052_v14, %v2907_v21  ;;  %v3267_v48 = vadd.f32 %v4712_v2, %v3061_v13  ;;  %v4720_v7 = vpop.f32.mrf.mxu1 }
 0x880   : > { %v4681_v18 = vpop.f32.mrf.mxu0 }
 0x881   : > { %v3302_v17 = vmax.f32 %v3286_v12, 0.0  ;;  %v3265_v1 = vadd.f32 %v3214_v45, %v3053_v59  ;;  %v3064_v40 = vadd.f32 %v4681_v18, %v5543_v15  ;;  %v3318_v51 = vpack.c.bf16 %v3304_v16, %v3303_v19 }
 0x882   : > { %v3055_v42 = vpop.f32.mrf.mxu0  ;;  %v3291_v45 = vadd.f32 %v5595_v5, %v3267_v48 }
 0x883   : > { %v3317_v50 = vpack.c.bf16 %v3302_v17, %v3301_v60  ;;  %v3268_v52 = vadd.f32 %v4713_v47, %v3064_v40  ;;  %v3056_v54 = vadd.f32 %v3055_v42, %v5545_v22  ;;  %v3289_v21 = vadd.f32 %v5595_v5, %v3265_v1  ;;  %v3246_v60 = vpop.f32.mrf.mxu1 }
 0x884   : > { %v4684_v55 = vpop.f32.mrf.mxu0  ;;  %v3307_v9 = vmax.f32 %v3291_v45, 0.0 }
 0x885   : > { %4738 = vmatprep.mubr.bf16.mxu0 %v3317_v50  ;;  %v3292_v56 = vadd.f32 %v5595_v5, %v3268_v52  ;;  %v3266_v58 = vadd.f32 %v3217_v49, %v3056_v54  ;;  %v3077_v2 = vadd.f32 %v4684_v55, %v5549_v23  ;;  %v3305_v4 = vmax.f32 %v3289_v21, 0.0  ;;  %v4721_v1 = vpop.f32.mrf.mxu1 }
 0x886   : > { %4739 = vmatmul.mubr.bf16.vlgmr.msra.gmra.mxu0 %v3318_v51  ;;  %v3068_v3 = vpop.f32.mrf.mxu0 }
 0x887   : > { %v3290_v15 = vadd.f32 %v5595_v5, %v3266_v58  ;;  %v3069_v47 = vadd.f32 %v3068_v3, %v5553_v25  ;;  %v3308_v6 = vmax.f32 %v3292_v56, 0.0  ;;  %v3271_v12 = vadd.f32 %v4716_v57, %v3077_v2  ;;  %v3249_v56 = vpop.f32.mrf.mxu1 }
 0x888   : > { %v4685_v22 = vpop.f32.mrf.mxu0 }
 0x889   : > { %v3306_v8 = vmax.f32 %v3290_v15, 0.0  ;;  %v3269_v10 = vadd.f32 %v3230_v11, %v3069_v47  ;;  %v3080_v53 = vadd.f32 %v4685_v22, %v5557_v27  ;;  %v3320_v16 = vpack.c.bf16 %v3308_v6, %v3307_v9 }
 0x88a   : > { %v3071_v49 = vpop.f32.mrf.mxu0  ;;  %v3295_v11 = vadd.f32 %v5595_v5, %v3271_v12 }
 0x88b   : > { %v3072_v13 = vadd.f32 %v3071_v49, %v5561_v29  ;;  %v3319_v14 = vpack.c.bf16 %v3306_v8, %v3305_v4  ;;  %v3272_v59 = vadd.f32 %v4717_v37, %v3080_v53  ;;  %v3293_v25 = vadd.f32 %v5595_v5, %v3269_v10  ;;  %v5623_v4 = vld [vmem:[#allocation6 + $0xa] ss:$0 sm:$0xff] }
 0x88c   : > { %v4688_v23 = vpop.f32.mrf.mxu0  ;;  %v3311_v54 = vmax.f32 %v3295_v11, 0.0 }
 0x88d   : > { %v3270_v17 = vadd.f32 %v3233_v61, %v3072_v13  ;;  %4742 = vmatprep.mubr.bf16.mxu0 %v3319_v14  ;;  %v3296_v18 = vadd.f32 %v5595_v5, %v3272_v59  ;;  %v3093_v57 = vadd.f32 %v4688_v23, %v5565_v31  ;;  %v3309_v51 = vmax.f32 %v3293_v25, 0.0 }
 0x88e   : > { %v3084_v19 = vpop.f32.mrf.mxu0  ;;  %4743 = vmatmul.mubr.bf16.gmra.mxu0 %v3320_v16 }
 0x88f   : > { %v3294_v27 = vadd.f32 %v5595_v5, %v3270_v17  ;;  %v3085_v29 = vadd.f32 %v3084_v19, %v5569_v33  ;;  %v3312_v40 = vmax.f32 %v3296_v18, 0.0  ;;  %v3275_v55 = vadd.f32 %v4720_v7, %v3093_v57 }
 0x890   : > { %v4689_v37 = vpop.f32.mrf.mxu0 }
 0x891   : > { %v3310_v48 = vmax.f32 %v3294_v27, 0.0  ;;  %v3273_v42 = vadd.f32 %v3246_v60, %v3085_v29  ;;  %v3096_v50 = vadd.f32 %v4689_v37, %v5573_v35  ;;  %v3322_v45 = vpack.c.bf16 %v3312_v40, %v3311_v54 }
 0x892   : > { %v3087_v52 = vpop.f32.mrf.mxu0  ;;  %v3299_v15 = vadd.f32 %v5595_v5, %v3275_v55  ;;  %v3495_v54 = vlaneseq }
 0x893   : > { %v3276_v61 = vadd.f32 %v4721_v1, %v3096_v50  ;;  %v3088_v21 = vadd.f32 %v3087_v52, %v5577_v0  ;;  %v3321_v58 = vpack.c.bf16 %v3310_v48, %v3309_v51  ;;  %v3297_v31 = vadd.f32 %v5595_v5, %v3273_v42 }
 0x894   : > { %v3315_v22 = vmax.f32 %v3299_v15, 0.0 }
 0x895   : > { %v3300_v33 = vadd.f32 %v5595_v5, %v3276_v61  ;;  %v3274_v3 = vadd.f32 %v3249_v56, %v3088_v21  ;;  %4746 = vmatprep.mubr.bf16.mxu1 %v3321_v58  ;;  %v3313_v2 = vmax.f32 %v3297_v31, 0.0 }
 0x896   : > { %4747 = vmatmul.mubr.bf16.vlgmr.msra.gmra.mxu1 %v3322_v45 }
 0x897   : > { %v3298_v35 = vadd.f32 %v5595_v5, %v3274_v3  ;;  %v3316_v47 = vmax.f32 %v3300_v33, 0.0 }
 0x899   : > { %v3314_v6 = vmax.f32 %v3298_v35, 0.0  ;;  %v3324_v0 = vpack.c.bf16 %v3316_v47, %v3315_v22  ;;  %v3496_v35 = vand.u32 127, %v3495_v54  ;;  %v3511_v54 = vmax.f32 %v5559_v28, 0.0 }
 0x89b   : > { %v3323_v7 = vpack.c.bf16 %v3314_v6, %v3313_v2 }
 0x89d   : > { %4750 = vmatprep.mubr.bf16.mxu1 %v3323_v7 }
 0x89e   : > { %4751 = vmatmul.mubr.bf16.gmra.mxu1 %v3324_v0 }
 0x946   : > { %v4740_v8 = vpop.f32.mrf.mxu0 }
 0x947   : > { %v3441_v9 = vadd.f32 %v4740_v8, %v5623_v4 }
 0x948   : > { %v3432_v10 = vpop.f32.mrf.mxu0 }
 0x949   : > { %v3921_v53 = vmul.f32 -1.442695, %v3441_v9  ;;  %v3433_v49 = vadd.f32 %v5623_v4, %v3432_v10  ;;  %v3501_v10 = vand.u32 3, %v3496_v35 }
 0x94a   : > { %v4741_v12 = vpop.f32.mrf.mxu0 }
 0x94b   : > { %4986 = vpow2.f32 %v3921_v53  ;;  %v3919_v5 = vmul.f32 -1.442695, %v3433_v49  ;;  %v3444_v13 = vadd.f32 %v4741_v12, %v5623_v4  ;;  %vm5647_vm0 = vcmp.eq.s32.totalorder %v3501_v10, 3 }
 0x94c   : > { %v3435_v14 = vpop.f32.mrf.mxu0 }
 0x94d   : > { %4988 = vpow2.f32 %v3919_v5  ;;  %v3922_v16 = vmul.f32 -1.442695, %v3444_v13  ;;  %v3436_v59 = vadd.f32 %v5623_v4, %v3435_v14 }
 0x94e   : > { %v4744_v23 = vpop.f32.mrf.mxu0 }
 0x94f   : > { %4990 = vpow2.f32 %v3922_v16  ;;  %v3920_v60 = vmul.f32 -1.442695, %v3436_v59  ;;  %v3457_v17 = vadd.f32 %v4744_v23, %v5623_v4 }
 0x950   : > { %v3448_v25 = vpop.f32.mrf.mxu0 }
 0x951   : > { %4992 = vpow2.f32 %v3920_v60  ;;  %v3925_v18 = vmul.f32 -1.442695, %v3457_v17  ;;  %v3449_v19 = vadd.f32 %v5623_v4, %v3448_v25  ;;  %v3512_v17 = vmax.f32 %v5547_v62, 0.0 }
 0x952   : > { %v4745_v11 = vpop.f32.mrf.mxu0 }
 0x953   : > { %4994 = vpow2.f32 %v3925_v18  ;;  %v3923_v27 = vmul.f32 -1.442695, %v3449_v19  ;;  %v3460_v57 = vadd.f32 %v4745_v11, %v5623_v4 }
 0x954   : > { %v3451_v29 = vpop.f32.mrf.mxu0 }
 0x955   : > { %4996 = vpow2.f32 %v3923_v27  ;;  %v3926_v1 = vmul.f32 -1.442695, %v3460_v57  ;;  %v3452_v37 = vadd.f32 %v5623_v4, %v3451_v29 }
 0x956   : > { %v4748_v42 = vpop.f32.mrf.mxu1 }
 0x957   : > { %4998 = vpow2.f32 %v3926_v1  ;;  %v3924_v48 = vmul.f32 -1.442695, %v3452_v37  ;;  %v3473_v51 = vadd.f32 %v4748_v42, %v5623_v4  ;;  %v3510_v1 = vmax.f32 %v5551_v24, 0.0 }
 0x958   : > { %v4987_v40 = vpop.eup %4986  ;;  %v3464_v55 = vpop.f32.mrf.mxu1 }
 0x959   : > { %v3576_v50 = vadd.f32 1.0, %v4987_v40  ;;  %5000 = vpow2.f32 %v3924_v48  ;;  %v3929_v21 = vmul.f32 -1.442695, %v3473_v51  ;;  %v3465_v56 = vadd.f32 %v5623_v4, %v3464_v55 }
 0x95a   : > { %v4989_v52 = vpop.eup %4988  ;;  %v4749_v45 = vpop.f32.mrf.mxu1 }
 0x95b   : > { %5002 = vrcp.f32 %v3576_v50  ;;  %v3574_v61 = vadd.f32 1.0, %v4989_v52  ;;  %v3927_v33 = vmul.f32 -1.442695, %v3465_v56  ;;  %v3476_v3 = vadd.f32 %v4749_v45, %v5623_v4 }
 0x95c   : > { %v4991_v58 = vpop.eup %4990  ;;  %v3467_v2 = vpop.f32.mrf.mxu1  ;;  %v3513_v50 = vmax.f32 %v5555_v26, 0.0  ;;  %v3516_v45 = vmax.f32 %v5563_v30, 0.0 }
 0x95d   : > { %5004 = vrcp.f32 %v3574_v61  ;;  %v3577_v31 = vadd.f32 1.0, %v4991_v58  ;;  %v3930_v6 = vmul.f32 -1.442695, %v3476_v3  ;;  %v3468_v22 = vadd.f32 %v5623_v4, %v3467_v2 }
 0x95e   : > { %v4993_v15 = vpop.eup %4992  ;;  %5006 = vpow2.f32 %v3929_v21  ;;  %v4752_v7 = vpop.f32.mrf.mxu1 }
 0x95f   : > { %5008 = vrcp.f32 %v3577_v31  ;;  %v3575_v47 = vadd.f32 1.0, %v4993_v15  ;;  %v3928_v8 = vmul.f32 -1.442695, %v3468_v22  ;;  %v3489_v9 = vadd.f32 %v4752_v7, %v5623_v4 }
 0x960   : > { %5010 = vpow2.f32 %v3927_v33  ;;  %v4995_v0 = vpop.eup %4994  ;;  %v3480_v49 = vpop.f32.mrf.mxu1  ;;  %v3514_v15 = vmax.f32 %v5567_v32, 0.0 }
 0x961   : > { %5012 = vrcp.f32 %v3575_v47  ;;  %v3580_v53 = vadd.f32 1.0, %v4995_v0  ;;  %v3933_v5 = vmul.f32 -1.442695, %v3489_v9  ;;  %v3481_v13 = vadd.f32 %v5623_v4, %v3480_v49 }
 0x962   : > { %5014 = vpow2.f32 %v3930_v6  ;;  %v4997_v12 = vpop.eup %4996  ;;  %v4753_v16 = vpop.f32.mrf.mxu1  ;;  %v3517_v6 = vmax.f32 %v5571_v34, 0.0 }
 0x963   : > { %5016 = vpow2.f32 %v3928_v8  ;;  %v3578_v14 = vadd.f32 1.0, %v4997_v12  ;;  %v3931_v60 = vmul.f32 -1.442695, %v3481_v13  ;;  %v3492_v23 = vadd.f32 %v4753_v16, %v5623_v4 }
 0x964   : > { %5018 = vrcp.f32 %v3580_v53  ;;  %v4999_v59 = vpop.eup %4998  ;;  %v3483_v19 = vpop.f32.mrf.mxu1  ;;  %v3515_v8 = vmax.f32 %v5575_v63, 0.0  ;;  %v3520_v63 = vmax.f32 %v5579_v36, 0.0  ;;  %v3518_v13 = vmax.f32 %v5581_v38, 0.0 }
 0x965   : > { %5020 = vpow2.f32 %v3933_v5  ;;  %v3581_v18 = vadd.f32 1.0, %v4999_v59  ;;  %v3934_v27 = vmul.f32 -1.442695, %v3492_v23  ;;  %v3484_v57 = vadd.f32 %v5623_v4, %v3483_v19 }
 0x966   : > { %5022 = vrcp.f32 %v3578_v14  ;;  %v5001_v11 = vpop.eup %5000  ;;  %v3521_v59 = vmax.f32 %v5583_v39, 0.0  ;;  %v3519_v36 = vmax.f32 %v5585_v41, 0.0  ;;  %v3522_v41 = vmax.f32 %v5589_v44, 0.0 }
 0x967   : > { %5024 = vpow2.f32 %v3931_v60  ;;  %v3579_v29 = vadd.f32 1.0, %v5001_v11  ;;  %v3932_v40 = vmul.f32 -1.442695, %v3484_v57 }
 0x968   : > { %v5003_v62 = vpop.eup %5002  ;;  %5026 = vrcp.f32 %v3581_v18  ;;  %v3524_v18 = vmax.f32 %v5587_v43, 0.0  ;;  %v3525_v43 = vmax.f32 %v5591_v46, 0.0 }
 0x969   : > { %v3624_v37 = vsel %vm5647_vm0, %v3512_v17, %v5003_v62  ;;  %5028 = vpow2.f32 %v3934_v27 }
 0x96a   : > { %v5005_v48 = vpop.eup %5004  ;;  %3641 = vst.msk [vmem:[%s5654_s19 + $0x10] sm:$0xff] %vm3638_vm1, %v3624_v37  ;;  %5030 = vrcp.f32 %v3579_v29  ;;  %v3523_v29 = vmax.f32 %v5593_v20, 0.0 }
 0x96b   : > { %v5007_v42 = vpop.eup %5006  ;;  %v3622_v4 = vsel %vm5647_vm0, %v3510_v1, %v5005_v48  ;;  %5032 = vpow2.f32 %v3932_v40 }
 0x96c   : > { %v5009_v51 = vpop.eup %5008  ;;  %3639 = vst.msk [vmem:[%s5654_s19] sm:$0xff] %vm3638_vm1, %v3622_v4  ;;  %v3584_v24 = vadd.f32 1.0, %v5007_v42 }
 0x96d   : > { %v5011_v52 = vpop.eup %5010  ;;  %v3625_v55 = vsel %vm5647_vm0, %v3513_v50, %v5009_v51 }
 0x96e   : > { %v5013_v61 = vpop.eup %5012  ;;  %3642 = vst.msk [vmem:[%s5654_s19 + $0x18] sm:$0xff] %vm3638_vm1, %v3625_v55  ;;  %5034 = vrcp.f32 %v3584_v24  ;;  %v3582_v26 = vadd.f32 1.0, %v5011_v52 }
 0x96f   : > { %v5015_v21 = vpop.eup %5014  ;;  %v3623_v56 = vsel %vm5647_vm0, %v3511_v54, %v5013_v61 }
 0x970   : > { %v5017_v58 = vpop.eup %5016  ;;  %3640 = vst.msk [vmem:[%s5654_s19 + $0x8] sm:$0xff] %vm3638_vm1, %v3623_v56  ;;  %5036 = vrcp.f32 %v3582_v26  ;;  %v3585_v28 = vadd.f32 1.0, %v5015_v21 }
 0x971   : > { %v5019_v31 = vpop.eup %5018  ;;  %v3583_v33 = vadd.f32 1.0, %v5017_v58 }
 0x972   : > { %v5021_v3 = vpop.eup %5020  ;;  %v3628_v35 = vsel %vm5647_vm0, %v3516_v45, %v5019_v31  ;;  %5038 = vrcp.f32 %v3585_v28 }
 0x973   : > { %v5023_v2 = vpop.eup %5022  ;;  %3645 = vst.msk [vmem:[%s5654_s19 + $0x30] sm:$0xff] %vm3638_vm1, %v3628_v35  ;;  %5040 = vrcp.f32 %v3583_v33  ;;  %v3588_v30 = vadd.f32 1.0, %v5021_v3 }
 0x974   : > { %v5025_v47 = vpop.eup %5024  ;;  %v3626_v22 = vsel %vm5647_vm0, %v3514_v15, %v5023_v2 }
 0x975   : > { %v5027_v7 = vpop.eup %5026  ;;  %3643 = vst.msk [vmem:[%s5654_s19 + $0x20] sm:$0xff] %vm3638_vm1, %v3626_v22  ;;  %5042 = vrcp.f32 %v3588_v30  ;;  %v3586_v32 = vadd.f32 1.0, %v5025_v47 }
 0x976   : > { %v5029_v0 = vpop.eup %5028  ;;  %v3629_v9 = vsel %vm5647_vm0, %v3517_v6, %v5027_v7 }
 0x977   : > { %v5031_v10 = vpop.eup %5030  ;;  %3646 = vst.msk [vmem:[%s5654_s19 + $0x38] sm:$0xff] %vm3638_vm1, %v3629_v9  ;;  %5044 = vrcp.f32 %v3586_v32  ;;  %v3589_v34 = vadd.f32 1.0, %v5029_v0 }
 0x978   : > { %v5033_v53 = vpop.eup %5032  ;;  %v3627_v49 = vsel %vm5647_vm0, %v3515_v8, %v5031_v10 }
 0x979   : > { %3644 = vst.msk [vmem:[%s5654_s19 + $0x28] sm:$0xff] %vm3638_vm1, %v3627_v49  ;;  %5046 = vrcp.f32 %v3589_v34  ;;  %v3587_v12 = vadd.f32 1.0, %v5033_v53 }
 0x97b   : > { %v5035_v5 = vpop.eup %5034  ;;  %5048 = vrcp.f32 %v3587_v12 }
 0x97c   : > { %v3632_v14 = vsel %vm5647_vm0, %v3520_v63, %v5035_v5 }
 0x97d   : > { %v5037_v16 = vpop.eup %5036  ;;  %3649 = vst.msk [vmem:[%s5654_s19 + $0x50] sm:$0xff] %vm3638_vm1, %v3632_v14 }
 0x97e   : > { %v3630_v60 = vsel %vm5647_vm0, %v3518_v13, %v5037_v16 }
 0x97f   : > { %v5039_v23 = vpop.eup %5038  ;;  %3647 = vst.msk [vmem:[%s5654_s19 + $0x40] sm:$0xff] %vm3638_vm1, %v3630_v60 }
 0x980   : > { %v5041_v17 = vpop.eup %5040  ;;  %v3633_v38 = vsel %vm5647_vm0, %v3521_v59, %v5039_v23 }
 0x981   : > { %3650 = vst.msk [vmem:[%s5654_s19 + $0x58] sm:$0xff] %vm3638_vm1, %v3633_v38  ;;  %v3631_v39 = vsel %vm5647_vm0, %v3519_v36, %v5041_v17 }
 0x982   : > { %v5043_v19 = vpop.eup %5042  ;;  %3648 = vst.msk [vmem:[%s5654_s19 + $0x48] sm:$0xff] %vm3638_vm1, %v3631_v39 }
 0x983   : > { %v3636_v11 = vsel %vm5647_vm0, %v3524_v18, %v5043_v19 }
 0x984   : > { %v5045_v27 = vpop.eup %5044  ;;  %3653 = vst.msk [vmem:[%s5654_s19 + $0x70] sm:$0xff] %vm3638_vm1, %v3636_v11 }
 0x985   : > { %v3634_v57 = vsel %vm5647_vm0, %v3522_v41, %v5045_v27 }
 0x986   : > { %v5047_v62 = vpop.eup %5046  ;;  %3651 = vst.msk [vmem:[%s5654_s19 + $0x60] sm:$0xff] %vm3638_vm1, %v3634_v57 }
 0x987   : > { %v3637_v1 = vsel %vm5647_vm0, %v3525_v43, %v5047_v62 }
 0x988   : > { %v5049_v44 = vpop.eup %5048  ;;  %3654 = vst.msk [vmem:[%s5654_s19 + $0x78] sm:$0xff] %vm3638_vm1, %v3637_v1 }
 0x989   : > { %v3635_v37 = vsel %vm5647_vm0, %v3523_v29, %v5049_v44 }
 0x98a   : > { %3652 = vst.msk [vmem:[%s5654_s19 + $0x68] sm:$0xff] %vm3638_vm1, %v3635_v37 }
 0x98b PF: > { %p14_p7 = scmp.ge.s32.totalorder %s5297_s8, 4   ;;  %s5767_s12 = smov %s5192_s13 }
 0x98c   : > { %s5768_s13 = smov %s5196_s14  ;;  %s5769_s14 = smov %s5306_s11 }
 0x98d   : > { %s5770_s15 = smov %s5297_s8  ;;  %16 = sbr.rel (!%p14_p7) target bundleno = 4 (0x4), region = 106 }
 0x992   :  { %3677 = vsyncpa [#allocation3], 1 }
 0x993   :  { %3679 = vsyncpa [#allocation3 + $0x1], 1 }
 0x994   :  { %3680 = vsyncpa [#allocation5], 1 }

</bundles_post_ra>
